<compile_context>
chip_gen: v7x
topology: tpu7x:2x2x1
jax: 0.10.0
libtpu: 0.0.40
codegen_flags: <defaults>
</compile_context>

<pallas_src>
import jax
import jax.numpy as jnp
import numpy as np
from jax.experimental import pallas as pl
from jax.experimental.pallas import tpu as pltpu

_G = 2               # pillars packed per kernel row (lane-dense 128-wide output)
_C_RAW = 4           # raw point channels: x, y, z, intensity
_C_IN = 5            # packed per-point channels: ux, uy, uz, intensity, sentinel
_SIDE = 5            # per-pillar side channel: cx, cy, cz, npts, 1/max(npts, 1)
_SENTINEL = -1.0e9   # pre-activation value carried by padded point slots
_PTS_PER_CHUNK = 4   # points per matmul chunk (4 * 128 = 512 output lanes)


# ----------------------------- Pallas kernel --------------------------------
def _pfn_kernel(x_ref, side_ref, wt_ref, wsum_ref, wside_ref, shift_ref, out_ref):
    """Fused PillarVFE PFN layer for a tile of 2*TNh pillars.

    x_ref    : (TNh, 2*P*5)  bf16  centered points [ux,uy,uz,i,sent], 2 pillars/row
    side_ref : (TNh, 2*5)    f32   [cx,cy,cz,npts,1/npts] per pillar, 2 per row
    wt_ref   : (2*P*5, 2*P*64) bf16  block-diag per-point weight (BN scale folded)
    wsum_ref : (2*P*5, 2*64)   bf16  -> sum_p u_p @ (W_cluster*scale) per pillar
    wside_ref: (2*5,   2*64)   f32   -> center @ (W_xyz*scale) per pillar
    shift_ref: (1, 2*64)       f32   folded BN shift
    out_ref  : (TNh, 2*64)     f32   pooled pillar features, 2 pillars/row
    """
    two_f = out_ref.shape[-1]
    f = two_f // 2
    p_max = x_ref.shape[-1] // (_G * _C_IN)
    rows = x_ref.shape[0]
    hi = jax.lax.Precision.HIGHEST

    x = x_ref[...]                                   # bf16
    side = side_ref[...]                             # f32

    # Per-pillar cluster-sum term: sum_p u_p @ Wc (centered => small => single
    # bf16 MXU pass is numerically safe).
    s = jnp.dot(x, wsum_ref[...], preferred_element_type=jnp.float32)
    # Per-pillar absolute-position term: needs f32 accuracy (centers are tens
    # of meters) but K=10, so a multi-pass HIGHEST matmul is negligible MXU.
    cb = jnp.dot(side, wside_ref[...], precision=hi,
                 preferred_element_type=jnp.float32)

    lane = jax.lax.broadcasted_iota(jnp.int32, (rows, two_f), 1)
    left = lane < f                      # lanes [0:f] = pillar 0, [f:2f] = pillar 1
    npts = jnp.where(left, side[:, _SIDE - 2:_SIDE - 1],
                     side[:, 2 * _SIDE - 2:2 * _SIDE - 1])
    inv = jnp.where(left, side[:, _SIDE - 1:_SIDE],
                    side[:, 2 * _SIDE - 1:2 * _SIDE])

    # Per-pillar bias shared by all points (hoisted out of the point loop):
    #   bias = center @ W_xyz_s - mean(centered xyz) @ W_cluster_s
    bias = cb - s * inv

    # torch zeroes padded features before linear+BN+ReLU+max, so a pillar with
    # padded slots must see a pre-shift value of exactly 0 inside the max; in
    # the hoisted-bias form that is an initial accumulator of -bias.  Fully
    # occupied pillars start at -3e38 (never beats a real point).
    acc = jnp.where(npts < float(p_max), -bias, jnp.float32(-3.0e38))

    # Pooled max over points.  Padded slots carry a -1e9 sentinel straight
    # through the matmul (weight row of ones), so the loop body is a single
    # VPU max per point.  The matmul is chunked over point groups to bound the
    # live f32 intermediate (v7x VMEM) and interleave MXU pushes with VPU max.
    chunk = min(p_max, _PTS_PER_CHUNK)
    for c0 in range(0, p_max, chunk):
        npc = min(chunk, p_max - c0)
        tc = jnp.dot(x, wt_ref[:, c0 * two_f:(c0 + npc) * two_f],
                     preferred_element_type=jnp.float32)
        for q in range(npc):
            acc = jnp.maximum(acc, tc[:, q * two_f:(q + 1) * two_f])

    # folded BN shift + ReLU commute with the max -> applied once per pillar
    out_ref[...] = jnp.maximum(acc + bias + shift_ref[...], 0.0)


# ------------------------- parameter folding (host) --------------------------
def fold_pfn_params(linear_weight, bn_gamma, bn_beta, bn_mean, bn_var, bn_eps,
                    max_points):
    """Fold Linear(10->F, bias=False) + BatchNorm1d(F) (eval mode) into the
    centered / block-structured weights consumed by the Pallas kernel."""
    w = np.asarray(linear_weight, np.float32)             # (10, F)
    c_in, f = w.shape
    assert c_in == 10  # USE_ABSLOTE_XYZ=True, WITH_DISTANCE=False -> 4+3+3
    p = int(max_points)

    scale = np.asarray(bn_gamma, np.float32) / np.sqrt(
        np.asarray(bn_var, np.float32) + float(bn_eps))
    shift = np.asarray(bn_beta, np.float32) - np.asarray(bn_mean, np.float32) * scale
    w_s = w * scale[None, :]                               # BN scale folded into W

    # With u = xyz - pillar_center and m' = mean_valid(u):
    #   y_p = u_p @ A + i_p * b + center @ W_s[0:3] - m' @ W_s[4:7]  (+ shift)
    a_xyz = w_s[0:3] + w_s[4:7] + w_s[7:10]                # (3, F) centered-xyz weight
    b_int = w_s[3:4]                                       # (1, F) intensity weight
    w_cluster = w_s[4:7]                                   # (3, F) multiplies -m'
    w_center = w_s[0:3]                                    # (3, F) multiplies +center

    per_pt = np.concatenate(
        [a_xyz, b_int, np.ones((1, f), np.float32)], axis=0)          # (5, F)
    cluster_rows = np.concatenate(
        [w_cluster, np.zeros((2, f), np.float32)], axis=0)            # (5, F)

    g, ci = _G, _C_IN
    wt = np.zeros((g * p * ci, g * p * f), np.float32)
    wsum = np.zeros((g * p * ci, g * f), np.float32)
    for gg in range(g):
        for pp in range(p):
            r = (gg * p + pp) * ci
            col = (pp * g + gg) * f          # point-p slice = [pillar0 | pillar1]
            wt[r:r + ci, col:col + f] = per_pt
            wsum[r:r + ci, gg * f:(gg + 1) * f] = cluster_rows
    wside = np.zeros((g * _SIDE, g * f), np.float32)
    for gg in range(g):
        wside[gg * _SIDE:gg * _SIDE + 3, gg * f:(gg + 1) * f] = w_center

    return {
        # kernel operands
        "wt": jnp.asarray(wt, jnp.bfloat16),
        "wsum": jnp.asarray(wsum, jnp.bfloat16),
        "wside": jnp.asarray(wside),
        "shift2": jnp.asarray(np.tile(shift, g)[None, :]),
        # raw / folded f32 pieces, kept only for the reference checks
        "w": jnp.asarray(w),
        "bn_scale": jnp.asarray(scale[None, :]),
        "bn_shift": jnp.asarray(shift[None, :]),
        "w_pt_xyz": jnp.asarray(a_xyz),
        "w_pt_int": jnp.asarray(b_int),
        "w_cluster": jnp.asarray(w_cluster),
        "w_center": jnp.asarray(w_center),
    }


# ------------------------------- helpers --------------------------------------
def _pillar_centers(coords, voxel_size, point_cloud_range):
    vx, vy, vz = voxel_size
    cx = coords[:, 3].astype(jnp.float32) * vx + (vx / 2.0 + point_cloud_range[0])
    cy = coords[:, 2].astype(jnp.float32) * vy + (vy / 2.0 + point_cloud_range[1])
    cz = coords[:, 1].astype(jnp.float32) * vz + (vz / 2.0 + point_cloud_range[2])
    return jnp.stack([cx, cy, cz], axis=-1)


def _pick_tile_rows(rows, tile_n):
    """Rows (pillar pairs) per grid step: multiple of 16 (bf16 sublane pack)
    and an even grid length so v7x's two TensorCores get equal work."""
    tnh = max(16, (tile_n // _G) // 16 * 16)
    if tnh >= rows:
        return rows                            # single full block
    steps = (rows + tnh - 1) // tnh
    if steps > 1 and steps % 2:
        steps += 1                             # even grid for the megacore split
    tnh = (rows + steps - 1) // steps
    tnh = ((tnh + 15) // 16) * 16
    return min(tnh, rows)


# ------------------------------ forward wrapper -------------------------------
def pillar_vfe_forward(voxel_features, voxel_num_points, coords, params,
                       voxel_size, point_cloud_range, *, tile_n=2048,
                       vmem_limit_bytes=None):
    """
    voxel_features  : (N, P, 4) f32  [x, y, z, intensity] (padded slots zeroed)
    voxel_num_points: (N,)      i32
    coords          : (N, 4)    i32  [batch, z, y, x]
    Returns vfe_features (N, 64) f32.
    """
    n, p, c = voxel_features.shape
    assert c == _C_RAW
    f = params["shift2"].shape[-1] // _G

    # tiny per-pillar side channel (f32: geometric center, npts, 1/max(npts,1))
    center = _pillar_centers(coords, voxel_size, point_cloud_range)       # (N, 3)
    nf = voxel_num_points.astype(jnp.float32)
    inv = 1.0 / jnp.maximum(nf, 1.0)
    side = jnp.concatenate([center, nf[:, None], inv[:, None]], axis=-1)  # (N, 5)

    # centered, masked, sentinel-augmented per-point channels (bf16): the cast
    # happens only AFTER subtracting the center, so operands stay sub-pillar.
    mask = jnp.arange(p, dtype=jnp.int32)[None, :] < voxel_num_points[:, None]
    u = voxel_features[:, :, :3] - center[:, None, :]
    ui = jnp.where(mask[:, :, None],
                   jnp.concatenate([u, voxel_features[:, :, 3:4]], axis=-1), 0.0)
    sent = jnp.where(mask, 0.0, _SENTINEL)[:, :, None]
    pts = jnp.concatenate([ui, sent], axis=-1).astype(jnp.bfloat16)       # (N, P, 5)

    n_pad = n
    if n % _G:
        extra = _G - n % _G                 # dummy pillar(s) so 2 pack per row
        pts = jnp.pad(pts, ((0, extra), (0, 0), (0, 0)))
        side = jnp.pad(side, ((0, extra), (0, 0)))
        n_pad = n + extra
    rows = n_pad // _G
    x2 = pts.reshape(rows, _G * p * _C_IN)          # free row-major reshape
    side2 = side.reshape(rows, _G * _SIDE)

    tnh = _pick_tile_rows(rows, tile_n)
    grid = (pl.cdiv(rows, tnh),)                    # masked partial tail block

    cost = pl.CostEstimate(
        flops=int(2 * n * p * 10 * f),              # useful FLOPs (no zero padding)
        transcendentals=0,
        bytes_accessed=int(x2.size * 2 + side2.size * 4 + rows * _G * f * 4
                           + params["wt"].size * 2 + params["wsum"].size * 2
                           + params["wside"].size * 4 + params["shift2"].size * 4),
    )

    out2 = pl.pallas_call(
        _pfn_kernel,
        out_shape=jax.ShapeDtypeStruct((rows, _G * f), jnp.float32),
        grid_spec=pltpu.PrefetchScalarGridSpec(
            num_scalar_prefetch=0,
            grid=grid,
            in_specs=[
                pl.BlockSpec((tnh, _G * p * _C_IN), lambda i: (i, 0)),
                pl.BlockSpec((tnh, _G * _SIDE), lambda i: (i, 0)),
                # constant operands (index_map == 0): never re-fetched; left
                # double-buffered on purpose (pl.Buffered(1) skipped -> ~300 KB
                # extra VMEM, conservative compile path).
                pl.BlockSpec((_G * p * _C_IN, _G * p * f), lambda i: (0, 0)),
                pl.BlockSpec((_G * p * _C_IN, _G * f), lambda i: (0, 0)),
                pl.BlockSpec((_G * _SIDE, _G * f), lambda i: (0, 0)),
                pl.BlockSpec((1, _G * f), lambda i: (0, 0)),
            ],
            out_specs=pl.BlockSpec((tnh, _G * f), lambda i: (i, 0)),
        ),
        compiler_params=pltpu.CompilerParams(
            dimension_semantics=("parallel",),       # megacore-shardable on v7x
            vmem_limit_bytes=vmem_limit_bytes,       # ~8 MB/step at tile_n=2048;
        ),                                           # fits default scoped VMEM
        cost_estimate=cost,
    )(x2, side2, params["wt"], params["wsum"], params["wside"], params["shift2"])

    # (N/2, 128) -> (N, 64) is a free row-major reshape (lane-dense store trick)
    return out2.reshape(n_pad, f)[:n]


# ------------------------------- references -----------------------------------
def _reference(voxel_features, voxel_num_points, coords, params,
               voxel_size, point_cloud_range):
    """Pure-JAX f32 transcription of the PyTorch PillarVFE forward (eval BN)."""
    p = voxel_features.shape[1]
    npts = jnp.maximum(voxel_num_points, 1).astype(jnp.float32)[:, None, None]
    xyz = voxel_features[:, :, :3]
    f_cluster = xyz - jnp.sum(xyz, 1, keepdims=True) / npts
    center = _pillar_centers(coords, voxel_size, point_cloud_range)
    f_center = xyz - center[:, None, :]
    feats = jnp.concatenate([voxel_features, f_cluster, f_center], -1)
    mask = (jnp.arange(p)[None, :] < voxel_num_points[:, None]).astype(jnp.float32)
    feats = feats * mask[:, :, None]
    y = jnp.einsum("npc,cf->npf", feats, params["w"],
                   precision=jax.lax.Precision.HIGHEST)
    y = y * params["bn_scale"][None] + params["bn_shift"][None]
    y = jnp.maximum(y, 0.0)
    return jnp.max(y, axis=1)


def _reference_kernel_mirror(voxel_features, voxel_num_points, coords, params,
                             voxel_size, point_cloud_range):
    """Same centered / folded / bf16-quantized arithmetic as the kernel, in
    plain JAX -- isolates structural kernel bugs from expected bf16 rounding."""
    p = voxel_features.shape[1]
    hi = jax.lax.Precision.HIGHEST
    q = lambda v: v.astype(jnp.bfloat16).astype(jnp.float32)
    center = _pillar_centers(coords, voxel_size, point_cloud_range)
    mask = jnp.arange(p)[None, :] < voxel_num_points[:, None]
    u = jnp.where(mask[:, :, None],
                  voxel_features[:, :, :3] - center[:, None, :], 0.0)
    it = jnp.where(mask[:, :, None], voxel_features[:, :, 3:4], 0.0)
    t = (jnp.einsum("npc,cf->npf", q(u), q(params["w_pt_xyz"]), precision=hi)
         + q(it) * q(params["w_pt_int"])[None])
    s = jnp.einsum("nc,cf->nf", jnp.sum(q(u), axis=1), q(params["w_cluster"]),
                   precision=hi)
    cb = jnp.einsum("nc,cf->nf", center, params["w_center"], precision=hi)
    inv = 1.0 / jnp.maximum(voxel_num_points.astype(jnp.float32), 1.0)
    bias = cb - s * inv[:, None]
    vals = jnp.where(mask[:, :, None], t + bias[:, None, :], 0.0)
    return jnp.maximum(jnp.max(vals, axis=1) + params["bn_shift"], 0.0)


if __name__ == "__main__":
    key = jax.random.PRNGKey(0)
    num_voxels, max_points, num_filters = 1283, 8, 64       # small demo shapes
    voxel_size = (0.16, 0.16, 4.0)
    pc_range = (0.0, -39.68, -3.0, 69.12, 39.68, 1.0)

    kx, ky, kn, ko, ki, kw = jax.random.split(key, 6)

    # pillar coords [batch, z, y, x] and realistic in-pillar points
    ix = jax.random.randint(kx, (num_voxels,), 0, 432)
    iy = jax.random.randint(ky, (num_voxels,), 0, 496)
    coords = jnp.stack([jnp.zeros_like(ix), jnp.zeros_like(ix), iy, ix],
                       axis=1).astype(jnp.int32)
    voxel_num_points = jax.random.randint(
        kn, (num_voxels,), 1, max_points + 1).astype(jnp.int32)

    center = _pillar_centers(coords, voxel_size, pc_range)               # (N, 3)
    off = (jax.random.uniform(ko, (num_voxels, max_points, 3)) - 0.5) \
        * jnp.asarray(voxel_size, jnp.float32)
    inten = jax.random.uniform(ki, (num_voxels, max_points, 1))
    raw = jnp.concatenate([center[:, None, :] + off, inten], axis=-1)
    mask = jnp.arange(max_points)[None, :] < voxel_num_points[:, None]
    voxel_features = jnp.where(mask[:, :, None], raw, 0.0)   # zero-padded slots

    # Linear(10 -> 64, bias=False) + BatchNorm1d(64) in eval mode
    w = jax.random.normal(kw, (10, 64), jnp.float32) * 0.1
    gamma = jnp.linspace(0.8, 1.2, 64, dtype=jnp.float32)
    beta = jnp.linspace(-0.05, 0.05, 64, dtype=jnp.float32)
    running_mean = jnp.zeros((64,), jnp.float32)
    running_var = jnp.ones((64,), jnp.float32)

    params = fold_pfn_params(w, gamma, beta, running_mean, running_var, 1e-3,
                             max_points)

    # tile_n=512 -> 4-step grid with a masked partial tail (exercises cdiv and
    # the even-grid tiling heuristic); production default is tile_n=2048.
    out = pillar_vfe_forward(voxel_features, voxel_num_points, coords, params,
                             voxel_size, pc_range, tile_n=512)
    out = jax.block_until_ready(out)
    assert out.shape == (num_voxels, num_filters)

    mirror = _reference_kernel_mirror(voxel_features, voxel_num_points, coords,
                                      params, voxel_size, pc_range)
    ref = _reference(voxel_features, voxel_num_points, coords, params,
                     voxel_size, pc_range)
    err_struct = float(jnp.max(jnp.abs(out - mirror)))
    err_f32 = float(jnp.max(jnp.abs(out - ref)))
    # Structural check against a reference using the same bf16 quantization as
    # the kernel: tight tolerance.
    assert err_struct < 2e-3, f"kernel vs bf16-mirror reference: {err_struct}"
    # Accuracy vs the pure-f32 torch-equivalent module: bounded by single-pass
    # bf16 MXU rounding of the centered (sub-pillar) operands.
    assert err_f32 < 5e-2, f"kernel vs f32 reference: {err_f32}"

    print("KERNEL_OK")
</pallas_src>

<mosaic_0001>
module attributes {stable_mosaic.version = 11 : i64} {
  func.func @_pfn_kernel(%arg0: i32, %arg1: memref<176x80xbf16, #tpu.memory_space<vmem>>, %arg2: memref<176x10xf32, #tpu.memory_space<vmem>>, %arg3: memref<80x1024xbf16, #tpu.memory_space<vmem>>, %arg4: memref<80x128xbf16, #tpu.memory_space<vmem>>, %arg5: memref<10x128xf32, #tpu.memory_space<vmem>>, %arg6: memref<1x128xf32, #tpu.memory_space<vmem>>, %arg7: memref<176x128xf32, #tpu.memory_space<vmem>>) attributes {dimension_semantics = [#tpu.dimension_semantics<parallel>], iteration_bounds = array<i64: 4>, scalar_prefetch = 0 : i64, scratch_operands = 0 : i64, tpu.core_type = #tpu.core_type<tc>, window_params = [{transform_indices = @transform_0, window_bounds = array<i64: 176, 80>}, {transform_indices = @transform_1, window_bounds = array<i64: 176, 10>}, {pipeline_mode = #tpu.pipeline_mode<synchronous>, transform_indices = @transform_2, window_bounds = array<i64: 80, 1024>}, {pipeline_mode = #tpu.pipeline_mode<synchronous>, transform_indices = @transform_3, window_bounds = array<i64: 80, 128>}, {pipeline_mode = #tpu.pipeline_mode<synchronous>, transform_indices = @transform_4, window_bounds = array<i64: 10, 128>}, {pipeline_mode = #tpu.pipeline_mode<synchronous>, transform_indices = @transform_5, window_bounds = array<i64: 1, 128>}, {transform_indices = @transform_6, window_bounds = array<i64: 176, 128>}]} {
    %c0 = arith.constant 0 : index
    %c0_0 = arith.constant 0 : index
    %0 = vector.load %arg1[%c0, %c0_0] : memref<176x80xbf16, #tpu.memory_space<vmem>>, vector<176x80xbf16>
    %c0_1 = arith.constant 0 : index
    %c0_2 = arith.constant 0 : index
    %1 = vector.load %arg2[%c0_1, %c0_2] : memref<176x10xf32, #tpu.memory_space<vmem>>, vector<176x10xf32>
    %c0_3 = arith.constant 0 : index
    %c0_4 = arith.constant 0 : index
    %2 = vector.load %arg4[%c0_3, %c0_4] : memref<80x128xbf16, #tpu.memory_space<vmem>>, vector<80x128xbf16>
    %cst = arith.constant dense<0.000000e+00> : vector<176x128xf32>
    %3 = tpu.matmul %0, %2, %cst {dimension_numbers = #tpu.dot_dimension_numbers<[1], [0], [0], [1], [0, 0, 1, 1], [], []>} : vector<176x80xbf16>, vector<80x128xbf16>, vector<176x128xf32> -> vector<176x128xf32>
    %c0_5 = arith.constant 0 : index
    %c0_6 = arith.constant 0 : index
    %4 = vector.load %arg5[%c0_5, %c0_6] : memref<10x128xf32, #tpu.memory_space<vmem>>, vector<10x128xf32>
    %cst_7 = arith.constant dense<0.000000e+00> : vector<176x128xf32>
    %5 = tpu.matmul %1, %4, %cst_7 {dimension_numbers = #tpu.dot_dimension_numbers<[1], [0], [0], [1], [0, 0, 1, 1], [], []>, precision = #tpu.contract_precision<fp32>} : vector<176x10xf32>, vector<10x128xf32>, vector<176x128xf32> -> vector<176x128xf32>
    %6 = tpu.iota {dimensions = array<i32: 1>} : vector<176x128xi32>
    %c64_i32 = arith.constant 64 : i32
    %7 = vector.broadcast %c64_i32 : i32 to vector<176x128xi32>
    %8 = arith.cmpi slt, %6, %7 : vector<176x128xi32>
    %9 = vector.extract_strided_slice %1 {offsets = [0, 3], sizes = [176, 1], strides = [1, 1]} : vector<176x10xf32> to vector<176x1xf32>
    %10 = vector.extract_strided_slice %1 {offsets = [0, 8], sizes = [176, 1], strides = [1, 1]} : vector<176x10xf32> to vector<176x1xf32>
    %11 = vector.shape_cast %9 : vector<176x1xf32> to vector<176x1xf32>
    %12 = vector.broadcast %11 : vector<176x1xf32> to vector<176x128xf32>
    %13 = vector.shape_cast %10 : vector<176x1xf32> to vector<176x1xf32>
    %14 = vector.broadcast %13 : vector<176x1xf32> to vector<176x128xf32>
    %15 = arith.select %8, %12, %14 : vector<176x128xi1>, vector<176x128xf32>
    %16 = vector.extract_strided_slice %1 {offsets = [0, 4], sizes = [176, 1], strides = [1, 1]} : vector<176x10xf32> to vector<176x1xf32>
    %17 = vector.extract_strided_slice %1 {offsets = [0, 9], sizes = [176, 1], strides = [1, 1]} : vector<176x10xf32> to vector<176x1xf32>
    %18 = vector.shape_cast %16 : vector<176x1xf32> to vector<176x1xf32>
    %19 = vector.broadcast %18 : vector<176x1xf32> to vector<176x128xf32>
    %20 = vector.shape_cast %17 : vector<176x1xf32> to vector<176x1xf32>
    %21 = vector.broadcast %20 : vector<176x1xf32> to vector<176x128xf32>
    %22 = arith.select %8, %19, %21 : vector<176x128xi1>, vector<176x128xf32>
    %23 = arith.mulf %3, %22 : vector<176x128xf32>
    %24 = arith.subf %5, %23 : vector<176x128xf32>
    %cst_8 = arith.constant 8.000000e+00 : f32
    %25 = vector.broadcast %cst_8 : f32 to vector<176x128xf32>
    %26 = arith.cmpf olt, %15, %25 : vector<176x128xf32>
    %cst_9 = arith.constant 0.000000e+00 : f32
    %27 = vector.broadcast %cst_9 : f32 to vector<176x128xf32>
    %28 = arith.subf %27, %24 : vector<176x128xf32>
    %cst_10 = arith.constant -3.000000e+38 : f32
    %29 = vector.broadcast %cst_10 : f32 to vector<176x128xf32>
    %30 = arith.select %26, %28, %29 : vector<176x128xi1>, vector<176x128xf32>
    %c0_11 = arith.constant 0 : index
    %c0_12 = arith.constant 0 : index
    %31 = vector.load %arg3[%c0_11, %c0_12] : memref<80x1024xbf16, #tpu.memory_space<vmem>>, vector<80x512xbf16>
    %cst_13 = arith.constant dense<0.000000e+00> : vector<176x512xf32>
    %32 = tpu.matmul %0, %31, %cst_13 {dimension_numbers = #tpu.dot_dimension_numbers<[1], [0], [0], [1], [0, 0, 1, 1], [], []>} : vector<176x80xbf16>, vector<80x512xbf16>, vector<176x512xf32> -> vector<176x512xf32>
    %33 = vector.extract_strided_slice %32 {offsets = [0, 0], sizes = [176, 128], strides = [1, 1]} : vector<176x512xf32> to vector<176x128xf32>
    %34 = arith.maximumf %30, %33 : vector<176x128xf32>
    %35 = vector.extract_strided_slice %32 {offsets = [0, 128], sizes = [176, 128], strides = [1, 1]} : vector<176x512xf32> to vector<176x128xf32>
    %36 = arith.maximumf %34, %35 : vector<176x128xf32>
    %37 = vector.extract_strided_slice %32 {offsets = [0, 256], sizes = [176, 128], strides = [1, 1]} : vector<176x512xf32> to vector<176x128xf32>
    %38 = arith.maximumf %36, %37 : vector<176x128xf32>
    %39 = vector.extract_strided_slice %32 {offsets = [0, 384], sizes = [176, 128], strides = [1, 1]} : vector<176x512xf32> to vector<176x128xf32>
    %40 = arith.maximumf %38, %39 : vector<176x128xf32>
    %c0_14 = arith.constant 0 : index
    %c512 = arith.constant 512 : index
    %41 = vector.load %arg3[%c0_14, %c512] : memref<80x1024xbf16, #tpu.memory_space<vmem>>, vector<80x512xbf16>
    %cst_15 = arith.constant dense<0.000000e+00> : vector<176x512xf32>
    %42 = tpu.matmul %0, %41, %cst_15 {dimension_numbers = #tpu.dot_dimension_numbers<[1], [0], [0], [1], [0, 0, 1, 1], [], []>} : vector<176x80xbf16>, vector<80x512xbf16>, vector<176x512xf32> -> vector<176x512xf32>
    %43 = vector.extract_strided_slice %42 {offsets = [0, 0], sizes = [176, 128], strides = [1, 1]} : vector<176x512xf32> to vector<176x128xf32>
    %44 = arith.maximumf %40, %43 : vector<176x128xf32>
    %45 = vector.extract_strided_slice %42 {offsets = [0, 128], sizes = [176, 128], strides = [1, 1]} : vector<176x512xf32> to vector<176x128xf32>
    %46 = arith.maximumf %44, %45 : vector<176x128xf32>
    %47 = vector.extract_strided_slice %42 {offsets = [0, 256], sizes = [176, 128], strides = [1, 1]} : vector<176x512xf32> to vector<176x128xf32>
    %48 = arith.maximumf %46, %47 : vector<176x128xf32>
    %49 = vector.extract_strided_slice %42 {offsets = [0, 384], sizes = [176, 128], strides = [1, 1]} : vector<176x512xf32> to vector<176x128xf32>
    %50 = arith.maximumf %48, %49 : vector<176x128xf32>
    %51 = arith.addf %50, %24 : vector<176x128xf32>
    %c0_16 = arith.constant 0 : index
    %c0_17 = arith.constant 0 : index
    %52 = vector.load %arg6[%c0_16, %c0_17] : memref<1x128xf32, #tpu.memory_space<vmem>>, vector<1x128xf32>
    %53 = vector.broadcast %52 : vector<1x128xf32> to vector<176x128xf32>
    %54 = arith.addf %51, %53 : vector<176x128xf32>
    %cst_18 = arith.constant 0.000000e+00 : f32
    %55 = vector.broadcast %cst_18 : f32 to vector<176x128xf32>
    %56 = arith.maximumf %54, %55 : vector<176x128xf32>
    %c0_19 = arith.constant 0 : index
    %c0_20 = arith.constant 0 : index
    %57 = vector.load %arg7[%c0_19, %c0_20] : memref<176x128xf32, #tpu.memory_space<vmem>>, vector<176x128xf32>
    tpu.vector_store %arg7[%c0_19, %c0_20], %56 {strides = array<i32>} : memref<176x128xf32, #tpu.memory_space<vmem>>, vector<176x128xf32>,
    return
  }
  func.func @transform_0(%arg0: i32) -> (i32, i32) {
    %c0_i32 = arith.constant 0 : i32
    %c0_i32_0 = arith.constant 0 : i32
    return %arg0, %c0_i32 : i32, i32
  }
  func.func @transform_1(%arg0: i32) -> (i32, i32) {
    %c0_i32 = arith.constant 0 : i32
    %c0_i32_0 = arith.constant 0 : i32
    return %arg0, %c0_i32 : i32, i32
  }
  func.func @transform_2(%arg0: i32) -> (i32, i32) {
    %c0_i32 = arith.constant 0 : i32
    %c0_i32_0 = arith.constant 0 : i32
    %c0_i32_1 = arith.constant 0 : i32
    return %c0_i32, %c0_i32_0 : i32, i32
  }
  func.func @transform_3(%arg0: i32) -> (i32, i32) {
    %c0_i32 = arith.constant 0 : i32
    %c0_i32_0 = arith.constant 0 : i32
    %c0_i32_1 = arith.constant 0 : i32
    return %c0_i32, %c0_i32_0 : i32, i32
  }
  func.func @transform_4(%arg0: i32) -> (i32, i32) {
    %c0_i32 = arith.constant 0 : i32
    %c0_i32_0 = arith.constant 0 : i32
    %c0_i32_1 = arith.constant 0 : i32
    return %c0_i32, %c0_i32_0 : i32, i32
  }
  func.func @transform_5(%arg0: i32) -> (i32, i32) {
    %c0_i32 = arith.constant 0 : i32
    %c0_i32_0 = arith.constant 0 : i32
    %c0_i32_1 = arith.constant 0 : i32
    return %c0_i32, %c0_i32_0 : i32, i32
  }
  func.func @transform_6(%arg0: i32) -> (i32, i32) {
    %c0_i32 = arith.constant 0 : i32
    %c0_i32_0 = arith.constant 0 : i32
    return %arg0, %c0_i32 : i32, i32
  }
}

</mosaic_0001>

<bundles_post_ra>
// kernel: tpu_custom_call.1
= control target key start
LH: loop header
LB: loop body
LE: loop exit
PB: predicated region body
PF: predicated region fallthrough
CT: control target
= control target key end

     0   :  { %11 = vsyncpa [#allocation3], 0  ;;  %s6648_s0 = inlined_call_operand.vmem [shape: bf16[642,80], index: 0, kind: input, shape index: {}]   ;;  %s6649_s1 = inlined_call_operand.vmem [shape: f32[642,10], index: 1, kind: input, shape index: {}]   ;;  %s6650_s2 = inlined_call_operand.vmem [shape: bf16[80,1024], index: 2, kind: input, shape index: {}]   ;;  %s6651_s3 = inlined_call_operand.vmem [shape: bf16[80,128], index: 3, kind: input, shape index: {}]   ;;  %s6652_s4 = inlined_call_operand.vmem [shape: f32[10,128], index: 4, kind: input, shape index: {}]   ;;  %s6653_s5 = inlined_call_operand.vmem [shape: f32[1,128], index: 5, kind: input, shape index: {}]   ;;  %s6654_s6 = inlined_call_operand.hbm [shape: f32[642,128], index: 6, kind: output, shape index: {}]  }
   0x1   :  { %13 = vsyncpa [#allocation3 + $0x1], 0  ;;  %s4633_s21 = smov 0   ;;  %s4635_s22 = smov 0  }
   0x2   :  { %s4637_s23 = smov 0   ;;  %s4639_s24 = smov 0  }
   0x3 LB: > { %s4654_s25 = sadd.s32 4294967295, %s4586_s24   ;;  %s3735_s26 = sadd.s32 4294967294, %s4586_s24   ;;  %s4586_s24 = sphi %s4639_s24, %s7069_s24   ;;  %s4582_s23 = sphi %s4637_s23, %s7068_s23   ;;  %s4578_s22 = sphi %s4635_s22, %s7067_s22   ;;  %s4574_s21 = sphi %s4633_s21, %s7066_s21  }
   0x4   : > { %s4658_s27 = sadd.s32 1, %s4586_s24   ;;  %s162_s28 = sadd.s32 1, %s4582_s23 }
   0x5   : > { %s159_s29 = ssub.s32 %s4586_s24, %s4658_s27  ;;  %p172_p0 = scmp.ne.s32.totalorder %s4582_s23, %s4578_s22 }
   0x6   : > { %p160_p1 = scmp.eq.s32.totalorder %s159_s29, 0  ;;  %p173_p2 = scmp.eq.s32.totalorder %s4654_s25, 3 }
   0x7   : > { %p178_p3 = scmp.ne.s32.totalorder %s4578_s22, %s4574_s21  ;;  %p179_p4 = scmp.eq.s32.totalorder %s3735_s26, 3 }
   0x8   : > { %s4669_s30 = scalar_select %p160_p1, %s4582_s23, %s162_s28  }
   0x9   : > { %p4671_p5 = por %p173_p2, %p172_p0  ;;  %p4675_p6 = por %p179_p4, %p178_p3 }
   0xa   : > { %p3738_p7 = scmp.ge.s32.totalorder %s4586_s24, 1  ;;  %p243_p8 = scmp.lt.s32.totalorder %s4586_s24, 5 }
   0xc   : > { %p244_p9 = pnand %p3738_p7, %p243_p8 }
   0xe   : > { %247 = sbr.rel (%p244_p9) target bundleno = 648 (0x288), region = 44 }
  0x15   : > { %v4497_v0 = vld [vmem:[%s6651_s3] sm:$0xff]   ;;  %v6665_v1 = vmov 0.0   ;;  %s4686_s11 = smul.u32 22, %s4654_s25  ;;  %v4589_v2 = vmov 3   ;;  %v4498_v3 = vld [vmem:[%s6651_s3 + $0x8] sm:$0xff]   ;;  %vm683_vm0 = vcmask 1041408  }
  0x16   : > { %4021 = vmatprep.subr.bf16.mxu0 %v6665_v1  ;;  %4490 = vset.pattern.permute.xlu1 %v4589_v2  ;;  %v614_v4 = vld [vmem:[%s6652_s4] sm:$0xff]  ;;  %v615_v5 = vld [vmem:[%s6652_s4 + $0x8] sm:$0x3]  ;;  %v4499_v12 = vld [vmem:[%s6651_s3 + $0x10] sm:$0xff]   ;;  %vm616_vm1 = vcmask 80896   ;;  %vm4590_vm2 = vmmov 0  }
  0x17   : > { %4022 = vmatpush3.bf16.msra.mxu0 %v4497_v0  ;;  %4489 = vset.pattern.permute.xlu0 %v4589_v2  ;;  %p291_p10 = scmp.lt.s32.totalorder %s4686_s11, 80  ;;  %v685_v6 = vsel %vm683_vm0, %v615_v5, 0  ;;  %v688_v7 = vand.u32 4294901760, %v614_v4  ;;  %v4707_v10 = vld [vmem:[%s6650_s2] sm:$0xff]  ;;  %v4500_v25 = vld [vmem:[%s6651_s3 + $0x18] sm:$0xff]   ;;  %vm459_vm3 = vcmask 654336  }
  0x18   : > { %4023 = vmatprep.subr.bf16.mxu0 %v6665_v1  ;;  %v691_v8 = vand.u32 4294901760, %v685_v6  ;;  %v4712_v11 = vld [vmem:[%s6650_s2 + $0x20] sm:$0xff]  ;;  %4031 = vmatprep.mubr.msk.bf16.mxu0 %vm4590_vm2, %v6665_v1  ;;  %s3650_s12 = ssub.s32 (%p4671_p5), 81, %s4686_s11 }
  0x19   : > { %s4700_s18 = scalar_select %p291_p10, %s4686_s11, 80  ;;  %v4702_v9 = vsub.f32 %v614_v4, %v688_v7  ;;  %v4735_v16 = vld [vmem:[%s6650_s2 + $0x40] sm:$0xff]  ;;  %v3768_v22 = vcombine.low %v4707_v10, %v4712_v11  ;;  %v3769_v23 = vcombine.high %v4707_v10, %v4712_v11 }
  0x1a   : > { %v4719_v13 = vpack.c.bf16 %v691_v8, %v688_v7  ;;  %v4721_v14 = vsub.f32 %v685_v6, %v691_v8  ;;  %v4740_v17 = vld [vmem:[%s6650_s2 + $0x60] sm:$0xff]  ;;  %p3651_p11 = scmp.lt.s32.totalorder (%p4671_p5), %s3650_s12, 22 }
  0x1b   : > { %4024 = vmatpush3.bf16.msra.mxu0 %v4498_v3  ;;  %s3740_s29 = sshll.u32 %s4700_s18, 3  ;;  %s3739_s15 = sshll.u32 %s4700_s18, 2  ;;  %v6664_v15 = vand.u32 4294901760, %v4702_v9  ;;  %v3773_v40 = vcombine.high %v4735_v16, %v4740_v17  ;;  %v4501_v47 = vld [vmem:[%s6651_s3 + $0x20] sm:$0xff]  }
  0x1c   : > { %4025 = vmatprep.subr.bf16.mxu0 %v6665_v1  ;;  %s4728_s14 = scalar_lea.vmem %s6649_s1, %s3740_s29  ;;  %4298 = vmatprep.subr.bf16.mxu1 %v4719_v13  ;;  %v6662_v21 = vand.u32 4294901760, %v4721_v14  ;;  %s4777_s9 = scalar_lea.vmem %s6648_s0, %s3739_s15  ;;  %v4980_v10 = vld [vmem:[%s6650_s2 + $0xc0] sm:$0xff] }
  0x1d   : > { %v4743_v18 = vld [vmem:[%s4728_s14 + $0x10] sm:$0xff]  ;;  %v4746_v19 = vld [vmem:[%s4728_s14] sm:$0xff]  ;;  %v4749_v20 = vld [vmem:[%s4728_s14 + $0x18] sm:$0xff]  ;;  %v978_v27 = vsub.f32 %v4702_v9, %v6664_v15  ;;  %4300 = vmatpush3.bf16.msra.mxu1 %v4719_v13 }
  0x1e   : > { %2061 = vperm.xlu1 %4490, %v4743_v18   ;;  %2053 = vperm.xlu0 %4489, %v4746_v19   ;;  %v4760_v24 = vld [vmem:[%s4728_s14 + $0x8] sm:$0xff]  ;;  %v618_v26 = vsel %vm616_vm1, %v4746_v19, 0  ;;  %v624_v28 = vsel %vm616_vm1, %v4743_v18, 0  ;;  %v627_v29 = vsel %vm616_vm1, %v4749_v20, 0  ;;  %v4784_v31 = vld [vmem:[%s4728_s14 + $0x20] sm:$0xff]  ;;  %v985_v33 = vsub.f32 %v4721_v14, %v6662_v21  ;;  %v4792_v34 = vld [vmem:[%s4728_s14 + $0x30] sm:$0xff] }
  0x1f   : > { %4026 = vmatpush3.bf16.msra.mxu0 %v4499_v12  ;;  %v4781_v30 = vld [vmem:[%s4728_s14 + $0x28] sm:$0xff]  ;;  %v4786_v32 = vand.u32 4294901760, %v618_v26  ;;  %v621_v35 = vsel %vm616_vm1, %v4760_v24, 0  ;;  %v4796_v36 = vand.u32 4294901760, %v624_v28  ;;  %v979_v37 = vand.u32 4294901760, %v978_v27  ;;  %v4816_v45 = vld [vmem:[%s4728_s14 + $0x38] sm:$0xff] }
  0x20   : > { %4027 = vmatprep.subr.bf16.mxu0 %v6665_v1  ;;  %v4799_v38 = vand.u32 4294901760, %v621_v35  ;;  %v986_v42 = vand.u32 4294901760, %v985_v33  ;;  %v4811_v44 = vand.u32 4294901760, %v627_v29  ;;  %v630_v48 = vsel %vm616_vm1, %v4784_v31, 0  ;;  %v4858_v0 = vld [vmem:[%s4728_s14 + $0x48] sm:$0xff]  ;;  %v4861_v2 = vld [vmem:[%s4728_s14 + $0x40] sm:$0xff] }
  0x21   : > { %6775 = vst [vmem:[#allocation5_spill] sm:$0xff] %v4796_v36  ;;  %v4806_v41 = vsub.f32 %v618_v26, %v4786_v32  ;;  %v4809_v43 = vsub.f32 %v624_v28, %v4796_v36  ;;  %v633_v49 = vsel %vm616_vm1, %v4781_v30, 0  ;;  %v636_v50 = vsel %vm616_vm1, %v4792_v34, 0  ;;  %v4872_v8 = vld [vmem:[%s4777_s9] sm:$0xff]  }
  0x22   : > { %6776 = vst [vmem:[#allocation6_spill] sm:$0xff] %v4799_v38  ;;  %6779 = vst [vmem:[#allocation9_spill] sm:$0xff] %v4811_v44  ;;  %2065 = vperm.xlu1 %4490, %v4749_v20   ;;  %2057 = vperm.xlu0 %4489, %v4760_v24   ;;  %v4819_v46 = vsub.f32 %v621_v35, %v4799_v38  ;;  %v4301_v52 = vpack.c.bf16 %v986_v42, %v979_v37  ;;  %v4837_v56 = vand.u32 4294901760, %v630_v48 }
  0x23   : > { %6777 = vst [vmem:[#allocation7_spill] sm:$0xff] %v4806_v41  ;;  %6778 = vst [vmem:[#allocation8_spill] sm:$0xff] %v4809_v43  ;;  %4028 = vmatpush3.bf16.msra.mxu0 %v4500_v25  ;;  %v6661_v51 = vand.u32 4294901760, %v4806_v41  ;;  %v6659_v53 = vand.u32 4294901760, %v4809_v43  ;;  %v4833_v54 = vsub.f32 %v627_v29, %v4811_v44  ;;  %v4839_v57 = vand.u32 4294901760, %v633_v49  ;;  %v4878_v25 = vld [vmem:[%s4728_s14 + $0x58] sm:$0xff] }
  0x24   : > { %6780 = vst [vmem:[#allocation10_spill] sm:$0xff] %v4819_v46  ;;  %4029 = vmatprep.subr.bf16.mxu0 %v6665_v1  ;;  %v6660_v55 = vand.u32 4294901760, %v4819_v46  ;;  %6782 = vst [vmem:[#allocation12_spill] sm:$0xff] %v4837_v56  ;;  %v4841_v58 = vand.u32 4294901760, %v636_v50  ;;  %4302 = vmatprep.subr.bf16.mxu1 %v4301_v52  ;;  %v639_v62 = vsel %vm616_vm1, %v4816_v45, 0  ;;  %v4864_v3 = vsub.f32 %v630_v48, %v4837_v56  ;;  %v4885_v29 = vld [vmem:[%s4728_s14 + $0x50] sm:$0xff] }
  0x25   : > { %6781 = vst [vmem:[#allocation11_spill] sm:$0xff] %v4833_v54  ;;  %6783 = vst [vmem:[#allocation13_spill] sm:$0xff] %v4839_v57  ;;  %v757_v59 = vsub.f32 %v4806_v41, %v6661_v51  ;;  %v777_v60 = vsub.f32 %v4809_v43, %v6659_v53  ;;  %v6657_v61 = vand.u32 4294901760, %v4833_v54  ;;  %v4867_v4 = vsub.f32 %v633_v49, %v4839_v57  ;;  %v4937_v53 = vld [vmem:[%s6650_s2 + $0x80] sm:$0xff] }
  0x26   : > { %6784 = vst [vmem:[#allocation14_spill] sm:$0xff] %v4841_v58  ;;  %2073 = vperm.xlu1 %4490, %v4781_v30   ;;  %2069 = vperm.xlu0 %4489, %v4784_v31   ;;  %v767_v63 = vsub.f32 %v4819_v46, %v6660_v55  ;;  %6785 = vst [vmem:[#allocation15_spill] sm:$0xff] %v4864_v3  ;;  %v4869_v5 = vand.u32 4294901760, %v639_v62  ;;  %v4881_v26 = vsub.f32 %v636_v50, %v4841_v58  ;;  %v4942_v55 = vld [vmem:[%s6650_s2 + $0xa0] sm:$0xff]  ;;  %v5078_v46 = vld [vmem:[%s4777_s9 + $0x10] sm:$0xff]  }
  0x27   : > { %6786 = vst [vmem:[#allocation16_spill] sm:$0xff] %v4867_v4  ;;  %v758_v6 = vand.u32 4294901760, %v757_v59  ;;  %4030 = vmatpush3.bf16.msra.mxu0 %v4501_v47  ;;  %v778_v7 = vand.u32 4294901760, %v777_v60  ;;  %6788 = vst [vmem:[#allocation18_spill] sm:$0xff] %v4872_v8  ;;  %v787_v12 = vsub.f32 %v4833_v54, %v6657_v61  ;;  %v6656_v28 = vand.u32 4294901760, %v4864_v3  ;;  %v4896_v47 = vld [vmem:[%s4728_s14 + $0x68] sm:$0xff] }
  0x28   : > { %6787 = vst [vmem:[#allocation17_spill] sm:$0xff] %v4869_v5  ;;  %6789 = vst [vmem:[#allocation19_spill] sm:$0xff] %v4881_v26  ;;  %v768_v27 = vand.u32 4294901760, %v767_v63  ;;  %v6655_v33 = vand.u32 4294901760, %v4867_v4  ;;  %v4889_v35 = vsub.f32 %v639_v62, %v4869_v5  ;;  %2678 = vmatprep.subr.bf16.mxu0 %v3769_v23  ;;  %v6658_v42 = vand.u32 4294901760, %v4881_v26  ;;  %v4919_v63 = vld [vmem:[%s4728_s14 + $0x60] sm:$0xff] }
  0x29   : > { %4079 = vmatprep.mubr.f32.mxu1 %v758_v6  ;;  %v788_v37 = vand.u32 4294901760, %v787_v12  ;;  %v642_v48 = vsel %vm616_vm1, %v4861_v2, 0  ;;  %v645_v49 = vsel %vm616_vm1, %v4858_v0, 0  ;;  %v797_v23 = vsub.f32 %v4864_v3, %v6656_v28  ;;  %6814 = vst [vmem:[#allocation40_spill] sm:$0xff] %v5078_v46 }
  0x2a   : > { %6790 = vst [vmem:[#allocation20_spill] sm:$0xff] %v4889_v35  ;;  %2081 = vperm.xlu1 %4490, %v4816_v45   ;;  %2077 = vperm.xlu0 %4489, %v4792_v34   ;;  %v807_v50 = vsub.f32 %v4867_v4, %v6655_v33  ;;  %v6663_v59 = vand.u32 4294901760, %v4889_v35  ;;  %v4911_v60 = vand.u32 4294901760, %v642_v48  ;;  %v817_v62 = vsub.f32 %v4881_v26, %v6658_v42 }
  0x2b   : > { %4080 = vmatmul.mubr.f32.vlgmr.msra.gmra.mrb[0].mxu1 %v768_v27  ;;  %4032 = vmatmul.mubr.msk.bf16.vlgmr.msra.gmra.mrb[0].mxu0 %vm459_vm3, %v4872_v8  ;;  %v4921_v6 = vand.u32 4294901760, %v645_v49  ;;  %v648_v12 = vsel %vm616_vm1, %v4885_v29, 0  ;;  %v651_v27 = vsel %vm616_vm1, %v4878_v25, 0  ;;  %v798_v33 = vand.u32 4294901760, %v797_v23  ;;  %v4958_v23 = vld [vmem:[%s4728_s14 + $0x70] sm:$0xff] }
  0x2c   : > { %6791 = vst [vmem:[#allocation21_spill] sm:$0xff] %v4911_v60  ;;  %4304 = vmatpush3.bf16.msra.mxu1 %v4301_v52  ;;  %4082 = vmatprep.mubr.f32.mxu1 %v778_v7  ;;  %v808_v28 = vand.u32 4294901760, %v807_v50  ;;  %v4928_v61 = vsub.f32 %v642_v48, %v4911_v60  ;;  %v4932_v42 = vpack.c.bf16 %v4721_v14, %v4702_v9  ;;  %v4947_v52 = vld [vmem:[%s4777_s9 + $0x8] sm:$0xff]   ;;  %v4955_v48 = vld [vmem:[%s4728_s14 + $0x78] sm:$0xff]  ;;  %v4966_v51 = vand.u32 4294901760, %v648_v12 }
  0x2d   : > { %6792 = vst [vmem:[#allocation22_spill] sm:$0xff] %v4921_v6  ;;  %4035 = vmatprep.mubr.msk.bf16.mxu0 %vm4590_vm2, %v6665_v1  ;;  %6794 = vst [vmem:[#allocation24_spill] sm:$0xff] %v4947_v52  ;;  %v4952_v7 = vsub.f32 %v4889_v35, %v6663_v59  ;;  %v4961_v50 = vsub.f32 %v645_v49, %v4921_v6  ;;  %2679 = vmatpush1.bf16.msra.mxu0 %v3768_v22  ;;  %v4968_v21 = vand.u32 4294901760, %v651_v27  ;;  %v6809_v8 = vmov 0.0  }
  0x2e   : > { %6793 = vst [vmem:[#allocation23_spill] sm:$0xff] %v4928_v61  ;;  %6796 = vst [vmem:[#allocation26_spill] sm:$0xff] %v4966_v51  ;;  %2089 = vperm.xlu1 %4490, %v4858_v0   ;;  %2085 = vperm.xlu0 %4489, %v4861_v2   ;;  %v818_v59 = vand.u32 4294901760, %v817_v62  ;;  %v6669_v15 = vand.u32 4294901760, %v4928_v61  ;;  %v654_v1 = vsel %vm616_vm1, %v4919_v63, 0  ;;  %v657_v49 = vsel %vm616_vm1, %v4896_v47, 0 }
  0x2f   : > { %6795 = vst [vmem:[#allocation25_spill] sm:$0xff] %v4961_v50  ;;  %6797 = vst [vmem:[#allocation27_spill] sm:$0xff] %v4968_v21  ;;  %4083 = vmatmul.mubr.f32.gmra.mrb[2].mxu1 %v788_v37  ;;  %v6678_v11 = vand.u32 4294901760, %v4961_v50  ;;  %v4984_v22 = vsub.f32 %v648_v12, %v4966_v51  ;;  %v4987_v62 = vsub.f32 %v651_v27, %v4968_v21  ;;  %v4989_v39 = vand.u32 4294901760, %v654_v1 }
  0x30   : > { %2680 = vmatprep.subr.bf16.mxu0 %v3773_v40  ;;  %4085 = vmatprep.mubr.f32.mxu1 %v798_v33  ;;  %v837_v37 = vsub.f32 %v4928_v61, %v6669_v15  ;;  %v4997_v35 = vand.u32 4294901760, %v657_v49  ;;  %v660_v12 = vsel %vm616_vm1, %v4958_v23, 0  ;;  %v663_v27 = vsel %vm616_vm1, %v4955_v48, 0  ;;  %v5007_v40 = vld [vmem:[%s6650_s2 + $0xe0] sm:$0xff] }
  0x31   : > { %6798 = vst [vmem:[#allocation28_spill] sm:$0xff] %v4984_v22  ;;  %6799 = vst [vmem:[#allocation29_spill] sm:$0xff] %v4987_v62  ;;  %4306 = vmatprep.subr.bf16.mxu1 %v4932_v42  ;;  %v847_v33 = vsub.f32 %v4961_v50, %v6678_v11  ;;  %v5014_v61 = vld [vmem:[%s4728_s14 + $0x80] sm:$0xff]  ;;  %v5017_v26 = vsub.f32 %v654_v1, %v4989_v39  ;;  %v6804_v4 = vcombine.low %v4735_v16, %v4740_v17  ;;  %v5027_v11 = vld [vmem:[%s4728_s14 + $0x88] sm:$0xff] }
  0x32   : > { %6800 = vst [vmem:[#allocation30_spill] sm:$0xff] %v4989_v39  ;;  %6801 = vst [vmem:[#allocation31_spill] sm:$0xff] %v4997_v35  ;;  %v3777_v3 = vcombine.high %v4937_v53, %v4942_v55  ;;  %2097 = vperm.xlu1 %4490, %v4878_v25   ;;  %2093 = vperm.xlu0 %4489, %v4885_v29   ;;  %v5031_v50 = vsub.f32 %v657_v49, %v4997_v35  ;;  %v5033_v1 = vand.u32 4294901760, %v660_v12  ;;  %v5094_v35 = vld [vmem:[%s4728_s14 + $0xa8] sm:$0xff] }
  0x33   : > { %6802 = vst [vmem:[#allocation32_spill] sm:$0xff] %v5014_v61  ;;  %6803 = vst [vmem:[#allocation33_spill] sm:$0xff] %v5017_v26  ;;  %2681 = vmatpush1.bf16.msra.mxu0 %v6804_v4  ;;  %v5035_v54 = vand.u32 4294901760, %v663_v27  ;;  %4086 = vmatmul.mubr.f32.gmra.mrb[4].mxu1 %v808_v28  ;;  %v828_v16 = vand.u32 4294901760, %v4952_v7  ;;  %v3776_v4 = vcombine.low %v4937_v53, %v4942_v55  ;;  %v838_v15 = vand.u32 4294901760, %v837_v37  ;;  %v5051_v7 = vld [vmem:[%s4728_s14 + $0x90] sm:$0xff] }
  0x34   : > { %6805 = vst [vmem:[#allocation34_spill] sm:$0xff] %v5027_v11  ;;  %6806 = vst [vmem:[#allocation35_spill] sm:$0xff] %v5031_v50  ;;  %4036 = vmatmul.mubr.msk.bf16.gmra.mrb[4].mxu0 %vm459_vm3, %v4947_v52  ;;  %v3781_v49 = vcombine.high %v4980_v10, %v5007_v40  ;;  %4088 = vmatprep.mubr.f32.mxu1 %v818_v59  ;;  %v6810_v28 = vand.u32 4294901760, %v4984_v22  ;;  %v5054_v17 = vsub.f32 %v660_v12, %v5033_v1 }
  0x35   : > { %6807 = vst [vmem:[#allocation36_spill] sm:$0xff] %v5033_v1  ;;  %6808 = vst [vmem:[#allocation37_spill] sm:$0xff] %v5035_v54  ;;  %4039 = vmatprep.mubr.msk.bf16.mxu0 %vm4590_vm2, %v6809_v8  ;;  %v666_v53 = vsel %vm616_vm1, %v5014_v61, 0  ;;  %v848_v55 = vand.u32 4294901760, %v847_v33  ;;  %2682 = vmatprep.subr.bf16.mxu0 %v3777_v3  ;;  %v6813_v59 = vand.u32 4294901760, %v4987_v62  ;;  %v5073_v33 = vsub.f32 %v663_v27, %v5035_v54 }
  0x36   : > { %v857_v52 = vsub.f32 %v4984_v22, %v6810_v28  ;;  %6811 = vst [vmem:[#allocation38_spill] sm:$0xff] %v5054_v17  ;;  %v5058_v43 = vand.u32 4294901760, %v666_v53  ;;  %2105 = vperm.xlu1 %4490, %v4896_v47   ;;  %2101 = vperm.xlu0 %4489, %v4919_v63   ;;  %v5066_v28 = vld [vmem:[%s4728_s14 + $0x98] sm:$0xff]  ;;  %v5070_v22 = vld [vmem:[%s4728_s14 + $0xa0] sm:$0xff]  ;;  %v669_v3 = vsel %vm616_vm1, %v5027_v11, 0  ;;  %v6815_v41 = vand.u32 4294901760, %v5017_v26 }
  0x37   : > { %v867_v37 = vsub.f32 %v4987_v62, %v6813_v59  ;;  %4089 = vmatmul.mubr.f32.gmra.mrb[6].mxu1 %v828_v16  ;;  %v5084_v1 = vand.u32 4294901760, %v669_v3  ;;  %v672_v12 = vsel %vm616_vm1, %v5051_v7, 0  ;;  %2683 = vmatpush1.bf16.msra.mxu0 %v3776_v4  ;;  %v678_v62 = vsel %vm616_vm1, %v5070_v22, 0 }
  0x38   : > { %6812 = vst [vmem:[#allocation39_spill] sm:$0xff] %v5058_v43  ;;  %v877_v59 = vsub.f32 %v5017_v26, %v6815_v41  ;;  %4091 = vmatprep.mubr.f32.mxu1 %v838_v15  ;;  %v858_v27 = vand.u32 4294901760, %v857_v52  ;;  %v5089_v54 = vsub.f32 %v666_v53, %v5058_v43  ;;  %v5091_v16 = vand.u32 4294901760, %v672_v12  ;;  %2684 = vmatprep.subr.bf16.mxu0 %v3781_v49  ;;  %v2574_v53 = vld [vmem:[%s6650_s2 + $0x100] sm:$0xff] }
  0x39   : > { %6816 = vst [vmem:[#allocation41_spill] sm:$0xff] %v5084_v1  ;;  %v675_v41 = vsel %vm616_vm1, %v5066_v28, 0  ;;  %v3780_v26 = vcombine.low %v4980_v10, %v5007_v40  ;;  %v868_v15 = vand.u32 4294901760, %v867_v37  ;;  %v6818_v52 = vand.u32 4294901760, %v5031_v50  ;;  %v2576_v43 = vld [vmem:[%s6650_s2 + $0x120] sm:$0xff] }
  0x3a   : > { %6817 = vst [vmem:[#allocation42_spill] sm:$0xff] %v5091_v16  ;;  %2113 = vperm.xlu1 %4490, %v4955_v48   ;;  %2109 = vperm.xlu0 %4489, %v4958_v23   ;;  %v878_v10 = vand.u32 4294901760, %v877_v59  ;;  %v6819_v40 = vand.u32 4294901760, %v5054_v17  ;;  %v5122_v49 = vand.u32 4294901760, %v675_v41  ;;  %v5130_v59 = vand.u32 4294901760, %v678_v62 }
  0x3b   : > { %v887_v4 = vsub.f32 %v5031_v50, %v6818_v52  ;;  %4092 = vmatmul.mubr.f32.gmra.mrb[8].mxu1 %v848_v55  ;;  %v5120_v52 = vsub.f32 %v669_v3, %v5084_v1  ;;  %v5128_v50 = vsub.f32 %v672_v12, %v5091_v16  ;;  %v5137_v3 = vld [vmem:[%s6650_s2 + $0x8] sm:$0xff]  ;;  %2685 = vmatpush1.bf16.msra.mxu0 %v3780_v26  ;;  %v5150_v1 = vld [vmem:[%s4777_s9 + $0x18] sm:$0xff]  }
  0x3c   : > { %4040 = vmatmul.mubr.msk.bf16.gmra.mrb[8].mxu0 %vm459_vm3, %v5078_v46  ;;  %v897_v37 = vsub.f32 %v5054_v17, %v6819_v40  ;;  %6820 = vst [vmem:[#allocation43_spill] sm:$0xff] %v5122_v49  ;;  %4094 = vmatprep.mubr.f32.mxu1 %v858_v27  ;;  %6821 = vst [vmem:[#allocation44_spill] sm:$0xff] %v5130_v59  ;;  %v681_v40 = vsel %vm616_vm1, %v5094_v35, 0  ;;  %v5142_v27 = vld [vmem:[%s6650_s2 + $0x28] sm:$0xff]  ;;  %v3784_v55 = vcombine.low %v2574_v53, %v2576_v43 }
  0x3d   : > { %4043 = vmatprep.mubr.msk.bf16.mxu0 %vm4590_vm2, %v6809_v8  ;;  %v888_v12 = vand.u32 4294901760, %v887_v4  ;;  %v6822_v17 = vand.u32 4294901760, %v5073_v33  ;;  %v3785_v16 = vcombine.high %v2574_v53, %v2576_v43  ;;  %6823 = vst [vmem:[#allocation45_spill] sm:$0xff] %v5150_v1  ;;  %v6729_v39 = vand.u32 4294901760, %v5120_v52 }
  0x3e   : > { %2121 = vperm.xlu1 %4490, %v5027_v11   ;;  %2117 = vperm.xlu0 %4489, %v5014_v61   ;;  %v5154_v21 = vsub.f32 %v675_v41, %v5122_v49  ;;  %v5156_v26 = vand.u32 4294901760, %v681_v40  ;;  %v898_v4 = vand.u32 4294901760, %v897_v37  ;;  %v6825_v61 = vand.u32 4294901760, %v5089_v54 }
  0x3f   : > { %v907_v46 = vsub.f32 %v5073_v33, %v6822_v17  ;;  %4095 = vmatmul.mubr.f32.gmra.mrb[10].mxu1 %v868_v15  ;;  %v6728_v43 = vand.u32 4294901760, %v5128_v50  ;;  %v5165_v15 = vsub.f32 %v678_v62, %v5130_v59  ;;  %2686 = vmatprep.subr.bf16.mxu0 %v3785_v16  ;;  %v3771_v41 = vcombine.high %v5137_v3, %v5142_v27 }
  0x40   : > { %6824 = vst [vmem:[#allocation46_spill] sm:$0xff] %v5156_v26  ;;  %4097 = vmatprep.mubr.f32.mxu1 %v878_v10  ;;  %v917_v17 = vsub.f32 %v5089_v54, %v6825_v61  ;;  %2687 = vmatpush1.bf16.msra.mxu0 %v3784_v55  ;;  %v6826_v53 = vand.u32 4294901760, %v4702_v9  ;;  %v6827_v10 = vand.u32 4294901760, %v4721_v14  ;;  %v927_v62 = vsub.f32 %v5120_v52, %v6729_v39  ;;  %v6836_v39 = vld [vmem:[#allocation37_spill] sm:$0xff] }
  0x41   : > { %v908_v61 = vand.u32 4294901760, %v907_v46  ;;  %v6727_v16 = vand.u32 4294901760, %v5154_v21  ;;  %v5184_v55 = vsub.f32 %v681_v40, %v5156_v26  ;;  %v937_v14 = vsub.f32 %v5128_v50, %v6728_v43  ;;  %2821 = vmatprep.subr.bf16.mxu0 %v3771_v41  ;;  %v5291_v43 = vld [vmem:[%s4777_s9 + $0x48] sm:$0xff]  }
  0x42   : > { %2129 = vperm.xlu1 %4490, %v5066_v28   ;;  %2125 = vperm.xlu0 %4489, %v5051_v7   ;;  %v5175_v37 = vpack.c.bf16 %v6827_v10, %v6826_v53  ;;  %v918_v9 = vand.u32 4294901760, %v917_v17  ;;  %v6726_v46 = vand.u32 4294901760, %v5165_v15  ;;  %v928_v40 = vand.u32 4294901760, %v927_v62  ;;  %v5202_v10 = vld [vmem:[%s4777_s9 + $0x20] sm:$0xff]  }
  0x43   : > { %4098 = vmatmul.mubr.f32.gmra.mrb[12].mxu1 %v888_v12  ;;  %v947_v12 = vsub.f32 %v5154_v21, %v6727_v16  ;;  %v938_v17 = vand.u32 4294901760, %v937_v14  ;;  %6828 = vst [vmem:[#allocation47_spill] sm:$0xff] %v5202_v10  ;;  %v4591_v41 = vmov 8   ;;  %v6835_v16 = vld [vmem:[#allocation36_spill] sm:$0xff] }
  0x44   : > { %4044 = vmatmul.mubr.msk.bf16.gmra.mrb[12].mxu0 %vm459_vm3, %v5150_v1  ;;  %4100 = vmatprep.mubr.f32.mxu1 %v898_v4  ;;  %v6725_v4 = vand.u32 4294901760, %v5184_v55  ;;  %v957_v53 = vsub.f32 %v5165_v15, %v6726_v46  ;;  %v6834_v46 = vld [vmem:[#allocation31_spill] sm:$0xff] }
  0x45   : > { %4047 = vmatprep.mubr.msk.bf16.mxu0 %vm4590_vm2, %v6809_v8 }
  0x46   : > { %2137 = vperm.xlu1 %4490, %v5094_v35   ;;  %2133 = vperm.xlu0 %4489, %v5070_v22   ;;  %v967_v62 = vsub.f32 %v5184_v55, %v6725_v4  ;;  %v6833_v4 = vld [vmem:[#allocation30_spill] sm:$0xff] }
  0x47   : > { %4101 = vmatmul.mubr.f32.gmra.mrb[14].mxu1 %v908_v61  ;;  %v948_v61 = vand.u32 4294901760, %v947_v12  ;;  %v5231_v12 = vld [vmem:[%s4777_s9 + $0x30] sm:$0xff]  }
  0x48   : > { %4103 = vmatprep.mubr.f32.mxu1 %v918_v9  ;;  %v958_v9 = vand.u32 4294901760, %v957_v53  ;;  %v968_v14 = vand.u32 4294901760, %v967_v62  ;;  %v5267_v53 = vld [vmem:[%s6650_s2 + $0x18] sm:$0xff] }
  0x49   : > { %v6830_v62 = vld [vmem:[#allocation27_spill] sm:$0xff] }
  0x4a   : > { %4492 = vset.pattern.permute.xlu1 %v4591_v41  ;;  %4491 = vset.pattern.permute.xlu0 %v4591_v41  ;;  %v5272_v41 = vld [vmem:[%s6650_s2 + $0x38] sm:$0xff] }
  0x4b   : > { %4104 = vmatmul.mubr.f32.gmra.mrb[16].mxu1 %v928_v40  ;;  %2145 = vperm.xlu1 %4492, %v4760_v24   ;;  %v5216_v40 = vld [vmem:[%s4777_s9 + $0x28] sm:$0xff]  }
  0x4c   : > { %2141 = vperm.xlu0 %4491, %v4746_v19   ;;  %4106 = vmatprep.mubr.f32.mxu1 %v938_v17  ;;  %v5262_v17 = vld [vmem:[%s4777_s9 + $0x40] sm:$0xff]  }
  0x4d   : > { %4048 = vmatmul.mubr.msk.bf16.gmra.mrb[16].mxu0 %vm459_vm3, %v5202_v10 }
  0x4e   : > { %4051 = vmatprep.mubr.msk.bf16.mxu0 %vm4590_vm2, %v6809_v8 }
  0x4f   : > { %4107 = vmatmul.mubr.f32.gmra.mrb[18].mxu1 %v948_v61  ;;  %2149 = vperm.xlu1 %4492, %v4743_v18   ;;  %v5276_v61 = vcombine.low %v5267_v53, %v5272_v41 }
  0x50   : > { %2153 = vperm.xlu0 %4491, %v4749_v20   ;;  %4109 = vmatprep.mubr.f32.mxu1 %v958_v9  ;;  %v6831_v9 = vld [vmem:[#allocation32_spill] sm:$0xff] }
  0x51   : > { %6829 = vst [vmem:[#allocation48_spill] sm:$0xff] %v5276_v61  ;;  %v6848_v61 = vld [vmem:[#allocation16_spill] sm:$0xff] }
  0x53   : > { %4110 = vmatmul.mubr.f32.gmra.mrb[20].mxu1 %v968_v14  ;;  %2157 = vperm.xlu1 %4492, %v4784_v31   ;;  %v6832_v14 = vmov %v5027_v11  ;;  %v6837_v11 = vld [vmem:[#allocation39_spill] sm:$0xff] }
  0x54   : > { %2161 = vperm.xlu0 %4491, %v4781_v30   ;;  %4116 = vmatprep.mubr.f32.mxu1 %v4786_v32 }
  0x55   : > { %4052 = vmatmul.mubr.msk.bf16.gmra.mrb[20].mxu0 %vm459_vm3, %v5216_v40 }
  0x56   : > { %4055 = vmatprep.mubr.msk.bf16.mxu0 %vm4590_vm2, %v6809_v8 }
  0x57   : > { %4117 = vmatmul.mubr.f32.vlgmr.msra.gmra.mrb[0].mxu1 %v4799_v38  ;;  %2165 = vperm.xlu1 %4492, %v4792_v34   ;;  %v6855_v38 = vld [vmem:[#allocation40_spill] sm:$0xff] }
  0x58   : > { %4308 = vmatpush3.bf16.msra.mxu1 %v4932_v42  ;;  %2169 = vperm.xlu0 %4491, %v4816_v45   ;;  %v5247_v42 = vld [vmem:[%s4777_s9 + $0x38] sm:$0xff]  }
  0x59   : > { %4119 = vmatprep.mubr.f32.mxu1 %v4796_v36  ;;  %4310 = vmatprep.subr.bf16.mxu1 %v4719_v13 }
  0x5b   : > { %4120 = vmatmul.mubr.f32.gmra.mrb[2].mxu1 %v4811_v44  ;;  %2173 = vperm.xlu1 %4492, %v4861_v2   ;;  %v2573_v44 = vld [vmem:[%s6650_s2 + $0xe8] sm:$0xff] }
  0x5c   : > { %2177 = vperm.xlu0 %4491, %v4858_v0   ;;  %4122 = vmatprep.mubr.f32.mxu1 %v4837_v56  ;;  %v2571_v56 = vld [vmem:[%s6650_s2 + $0xc8] sm:$0xff] }
  0x5d   : > { %4056 = vmatmul.mubr.msk.bf16.gmra.mrb[24].mxu0 %vm459_vm3, %v5231_v12 }
  0x5e   : > { %4059 = vmatprep.mubr.msk.bf16.mxu0 %vm4590_vm2, %v6809_v8 }
  0x5f   : > { %4123 = vmatmul.mubr.f32.gmra.mrb[4].mxu1 %v4839_v57  ;;  %2181 = vperm.xlu1 %4492, %v4885_v29  }
  0x60   : > { %2185 = vperm.xlu0 %4491, %v4878_v25   ;;  %4125 = vmatprep.mubr.f32.mxu1 %v4841_v58 }
  0x63   : > { %4126 = vmatmul.mubr.f32.gmra.mrb[6].mxu1 %v4869_v5  ;;  %2189 = vperm.xlu1 %4492, %v4919_v63   ;;  %v6847_v5 = vcombine.low %v5137_v3, %v5142_v27  ;;  %v6851_v3 = vld [vmem:[#allocation20_spill] sm:$0xff]  ;;  %v2575_v27 = vld [vmem:[%s6650_s2 + $0x108] sm:$0xff] }
  0x64   : > { %2193 = vperm.xlu0 %4491, %v4896_v47   ;;  %4128 = vmatprep.mubr.f32.mxu1 %v4911_v60  ;;  %v6846_v60 = vld [vmem:[#allocation15_spill] sm:$0xff] }
  0x65   : > { %4060 = vmatmul.mubr.msk.bf16.gmra.mrb[28].mxu0 %vm459_vm3, %v5247_v42 }
  0x66   : > { %4063 = vmatprep.mubr.msk.bf16.mxu0 %vm4590_vm2, %v6809_v8 }
  0x67   : > { %4129 = vmatmul.mubr.f32.gmra.mrb[8].mxu1 %v4921_v6  ;;  %2197 = vperm.xlu1 %4492, %v4958_v23   ;;  %v2569_v6 = vld [vmem:[%s6650_s2 + $0xa8] sm:$0xff] }
  0x68   : > { %2201 = vperm.xlu0 %4491, %v4955_v48   ;;  %4131 = vmatprep.mubr.f32.mxu1 %v4966_v51  ;;  %v2567_v51 = vld [vmem:[%s6650_s2 + $0x88] sm:$0xff] }
  0x69   : > { %v3779_v57 = vcombine.high %v2567_v51, %v2569_v6 }
  0x6b   : > { %4132 = vmatmul.mubr.f32.gmra.mrb[10].mxu1 %v6830_v62  ;;  %2205 = vperm.xlu1 %4492, %v6831_v9   ;;  %v6845_v62 = vmov 0  }
  0x6c   : > { %2209 = vperm.xlu0 %4491, %v6832_v14   ;;  %4134 = vmatprep.mubr.f32.mxu1 %v6833_v4  ;;  %v4592_v4 = vmov 4  }
  0x6d   : > { %4064 = vmatmul.mubr.msk.bf16.gmra.mrb[32].mxu0 %vm459_vm3, %v5262_v17 }
  0x6e   : > { %4067 = vmatprep.mubr.msk.bf16.mxu0 %vm4590_vm2, %v6809_v8 }
  0x6f   : > { %4135 = vmatmul.mubr.f32.gmra.mrb[12].mxu1 %v6834_v46  ;;  %2213 = vperm.xlu1 %4492, %v5051_v7   ;;  %v6838_v46 = vld [vmem:[#allocation41_spill] sm:$0xff] }
  0x70   : > { %2217 = vperm.xlu0 %4491, %v5066_v28   ;;  %4137 = vmatprep.mubr.f32.mxu1 %v6835_v16  ;;  %v5306_v16 = vld [vmem:[%s4777_s9 + $0x50] sm:$0xff]  }
  0x73   : > { %4138 = vmatmul.mubr.f32.gmra.mrb[14].mxu1 %v6836_v39  ;;  %2221 = vperm.xlu1 %4492, %v5070_v22   ;;  %v6839_v39 = vld [vmem:[#allocation42_spill] sm:$0xff] }
  0x74   : > { %2225 = vperm.xlu0 %4491, %v5094_v35   ;;  %4140 = vmatprep.mubr.f32.mxu1 %v6837_v11  ;;  %v6844_v11 = vld [vmem:[#allocation11_spill] sm:$0xff] }
  0x75   : > { %4068 = vmatmul.mubr.msk.bf16.gmra.mrb[36].mxu0 %vm459_vm3, %v5291_v43 }
  0x76   : > { %4071 = vmatprep.mubr.msk.bf16.mxu0 %vm4590_vm2, %v6809_v8  ;;  %v6734_v8 = vmov 0  }
  0x77   : > { %4141 = vmatmul.mubr.f32.gmra.mrb[16].mxu1 %v6838_v46  ;;  %4493 = vset.pattern.permute.xlu1 %v4592_v4 }
  0x78   : > { %4494 = vset.pattern.permute.xlu0 %v4592_v4  ;;  %2251 = vperm.xlu1 %4493, %v4746_v19   ;;  %v6840_v4 = vld [vmem:[#allocation7_spill] sm:$0xff] }
  0x79   : > { %2255 = vperm.xlu0 %4494, %v4760_v24   ;;  %4143 = vmatprep.mubr.f32.mxu1 %v6839_v39  ;;  %v2565_v39 = vld [vmem:[%s6650_s2 + $0x68] sm:$0xff] }
  0x7b   : > { %4144 = vmatmul.mubr.f32.gmra.mrb[18].mxu1 %v5122_v49  ;;  %v6841_v49 = vld [vmem:[#allocation10_spill] sm:$0xff] }
  0x7c   : > { %2259 = vperm.xlu1 %4493, %v4743_v18   ;;  %4146 = vmatprep.mubr.f32.mxu1 %v5130_v59  ;;  %v2563_v59 = vld [vmem:[%s6650_s2 + $0x48] sm:$0xff] }
  0x7d   : > { %2267 = vperm.xlu0 %4494, %v4784_v31   ;;  %4072 = vmatmul.mubr.msk.bf16.gmra.mrb[40].mxu0 %vm459_vm3, %v5306_v16  ;;  %v3775_v46 = vcombine.high %v2563_v59, %v2565_v39  ;;  %v3774_v58 = vcombine.low %v2563_v59, %v2565_v39  ;;  %v3778_v39 = vcombine.low %v2567_v51, %v2569_v6  ;;  %v6852_v51 = vld [vmem:[#allocation23_spill] sm:$0xff]  ;;  %v6853_v6 = vld [vmem:[#allocation25_spill] sm:$0xff] }
  0x7e   : > { %2710 = vmatprep.mubr.bf16.mxu0 %v6734_v8  ;;  %v6842_v8 = vld [vmem:[#allocation8_spill] sm:$0xff]  ;;  %v3783_v59 = vcombine.high %v2571_v56, %v2573_v44 }
  0x7f   : > { %4147 = vmatmul.mubr.f32.gmra.mrb[20].mxu1 %v5156_v26  ;;  %v6843_v26 = vld [vmem:[#allocation18_spill] sm:$0xff] }
  0x80   : > { %2263 = vperm.xlu1 %4493, %v4749_v20   ;;  %4153 = vmatprep.mubr.f32.mxu1 %v6840_v4 }
  0x81   : > { %2275 = vperm.xlu0 %4494, %v4792_v34  }
  0x83   : > { %4154 = vmatmul.mubr.f32.vlgmr.msra.gmra.mrb[0].mxu1 %v6841_v49 }
  0x84   : > { %4312 = vmatpush3.bf16.msra.mxu1 %v4719_v13  ;;  %2271 = vperm.xlu1 %4493, %v4781_v30  }
  0x85   : > { %2283 = vperm.xlu0 %4494, %v4861_v2   ;;  %4156 = vmatprep.mubr.f32.mxu1 %v6842_v8 }
  0x86   : > { %3788 = vmatmul.mubr.msk.bf16.vlgmr.msra.gmra.mrb[44].mxu0 %vm459_vm3, %v6843_v26  ;;  %4314 = vmatprep.subr.bf16.mxu1 %v5175_v37  ;;  %v6849_v26 = vld [vmem:[#allocation19_spill] sm:$0xff] }
  0x87   : > { %4157 = vmatmul.mubr.f32.gmra.mrb[2].mxu1 %v6844_v11  ;;  %2720 = vmatprep.mubr.bf16.mxu0 %v6845_v62 }
  0x88   : > { %2279 = vperm.xlu1 %4493, %v4816_v45   ;;  %4159 = vmatprep.mubr.f32.mxu1 %v6846_v60 }
  0x89   : > { %2291 = vperm.xlu0 %4494, %v4885_v29   ;;  %2822 = vmatpush1.bf16.msra.mxu0 %v6847_v5  ;;  %v6850_v5 = vld [vmem:[#allocation24_spill] sm:$0xff] }
  0x8a   : > { %2823 = vmatprep.subr.bf16.mxu0 %v3775_v46  ;;  %v2577_v46 = vld [vmem:[%s6650_s2 + $0x128] sm:$0xff] }
  0x8b   : > { %4160 = vmatmul.mubr.f32.gmra.mrb[4].mxu1 %v6848_v61  ;;  %v3786_v36 = vcombine.low %v2575_v27, %v2577_v46 }
  0x8c   : > { %2287 = vperm.xlu1 %4493, %v4858_v0   ;;  %4162 = vmatprep.mubr.f32.mxu1 %v6849_v26 }
  0x8d   : > { %2299 = vperm.xlu0 %4494, %v4919_v63   ;;  %2824 = vmatpush1.bf16.msra.mxu0 %v3774_v58  ;;  %v3787_v58 = vcombine.high %v2575_v27, %v2577_v46  ;;  %v6860_v27 = vld [vmem:[#allocation38_spill] sm:$0xff] }
  0x8e   : > { %3789 = vmatmul.mubr.msk.bf16.gmra.mrb[48].mxu0 %vm459_vm3, %v6850_v5  ;;  %2825 = vmatprep.subr.bf16.mxu0 %v3779_v57  ;;  %v3782_v57 = vcombine.low %v2571_v56, %v2573_v44  ;;  %v6854_v5 = vld [vmem:[#allocation28_spill] sm:$0xff]  ;;  %v6857_v44 = vld [vmem:[#allocation29_spill] sm:$0xff] }
  0x8f   : > { %4163 = vmatmul.mubr.f32.gmra.mrb[6].mxu1 %v6851_v3  ;;  %2730 = vmatprep.mubr.bf16.mxu0 %v6845_v62  ;;  %v6858_v56 = vld [vmem:[#allocation33_spill] sm:$0xff] }
  0x90   : > { %2295 = vperm.xlu1 %4493, %v4878_v25   ;;  %4165 = vmatprep.mubr.f32.mxu1 %v6852_v51 }
  0x91   : > { %2307 = vperm.xlu0 %4494, %v4958_v23   ;;  %2826 = vmatpush1.bf16.msra.mxu0 %v3778_v39  ;;  %v5378_v39 = vcombine.high %v5267_v53, %v5272_v41 }
  0x92   : > { %2827 = vmatprep.subr.bf16.mxu0 %v3783_v59  ;;  %v6859_v59 = vld [vmem:[#allocation35_spill] sm:$0xff] }
  0x93   : > { %4166 = vmatmul.mubr.f32.gmra.mrb[8].mxu1 %v6853_v6  ;;  %6856 = vst [vmem:[#allocation32_spill] sm:$0xff] %v5378_v39 }
  0x94   : > { %2303 = vperm.xlu1 %4493, %v4896_v47   ;;  %4168 = vmatprep.mubr.f32.mxu1 %v6854_v5 }
  0x95   : > { %2315 = vperm.xlu0 %4494, %v6831_v9   ;;  %2828 = vmatpush1.bf16.msra.mxu0 %v3782_v57 }
  0x96   : > { %3790 = vmatmul.mubr.msk.bf16.gmra.mrb[52].mxu0 %vm459_vm3, %v6855_v38  ;;  %2829 = vmatprep.subr.bf16.mxu0 %v3787_v58 }
  0x97   : > { %4169 = vmatmul.mubr.f32.gmra.mrb[10].mxu1 %v6857_v44  ;;  %2740 = vmatprep.mubr.bf16.mxu0 %v6845_v62 }
  0x98   : > { %2311 = vperm.xlu1 %4493, %v4955_v48   ;;  %4171 = vmatprep.mubr.f32.mxu1 %v6858_v56 }
  0x99   : > { %2323 = vperm.xlu0 %4494, %v5051_v7   ;;  %2830 = vmatpush1.bf16.msra.mxu0 %v3786_v36  ;;  %v4594_v36 = vmov 9  }
  0x9a   : > { %3315 = vmatprep.subr.bf16.mxu0 %v5378_v39 }
  0x9b   : > { %4172 = vmatmul.mubr.f32.gmra.mrb[12].mxu1 %v6859_v59 }
  0x9c   : > { %2319 = vperm.xlu1 %4493, %v6832_v14   ;;  %4174 = vmatprep.mubr.f32.mxu1 %v6860_v27 }
  0x9d   : > { %2331 = vperm.xlu0 %4494, %v5070_v22   ;;  %v5390_v53 = vpop.permute.xlu1 %2061  ;;  %v5392_v41 = vpop.permute.xlu0 %2053 }
  0x9e   : > { %3791 = vmatmul.mubr.msk.bf16.gmra.mrb[56].mxu0 %vm459_vm3, %v5150_v1 }
  0x9f   : > { %4175 = vmatmul.mubr.f32.gmra.mrb[14].mxu1 %v5073_v33  ;;  %2750 = vmatprep.mubr.bf16.mxu0 %v6845_v62 }
  0xa0   : > { %2327 = vperm.xlu1 %4493, %v5066_v28   ;;  %4177 = vmatprep.mubr.f32.mxu1 %v5089_v54 }
  0xa1   : > { %4495 = vset.pattern.permute.xlu0 %v4594_v36  ;;  %v5400_v46 = vpop.permute.xlu1 %2065  ;;  %v5402_v57 = vpop.permute.xlu0 %2057 }
  0xa2   : > { %2339 = vperm.xlu0 %4495, %v4746_v19  }
  0xa3   : > { %4178 = vmatmul.mubr.f32.gmra.mrb[16].mxu1 %v5120_v52 }
  0xa4   : > { %2335 = vperm.xlu1 %4493, %v5094_v35   ;;  %4180 = vmatprep.mubr.f32.mxu1 %v5128_v50 }
  0xa5   : > { %v5408_v58 = vpop.permute.xlu1 %2073  ;;  %v5410_v39 = vpop.permute.xlu0 %2069 }
  0xa6   : > { %2351 = vperm.xlu0 %4495, %v4749_v20   ;;  %3792 = vmatmul.mubr.msk.bf16.gmra.mrb[60].mxu0 %vm459_vm3, %v5202_v10  ;;  %v6861_v20 = vand.u32 4294901760, %v6840_v4 }
  0xa7   : > { %4181 = vmatmul.mubr.f32.gmra.mrb[18].mxu1 %v5154_v21  ;;  %2760 = vmatprep.mubr.bf16.mxu0 %v6845_v62 }
  0xa8   : > { %4496 = vset.pattern.permute.xlu1 %v4594_v36  ;;  %4183 = vmatprep.mubr.f32.mxu1 %v5165_v15 }
  0xa9   : > { %2343 = vperm.xlu1 %4496, %v4760_v24   ;;  %v5419_v19 = vpop.permute.xlu1 %2081  ;;  %v5421_v1 = vpop.permute.xlu0 %2077  ;;  %v6862_v24 = vand.u32 4294901760, %v6841_v49  ;;  %v6865_v49 = vand.u32 4294901760, %v6846_v60 }
  0xaa   : > { %2359 = vperm.xlu0 %4495, %v4781_v30   ;;  %v6863_v30 = vand.u32 4294901760, %v6842_v8 }
  0xab   : > { %4184 = vmatmul.mubr.f32.gmra.mrb[20].mxu1 %v5184_v55 }
  0xac   : > { %4190 = vmatprep.mubr.f32.mxu1 %v6861_v20  ;;  %v6872_v20 = vand.u32 4294901760, %v6857_v44  ;;  %v6875_v44 = vand.u32 4294901760, %v6860_v27 }
  0xad   : > { %2347 = vperm.xlu1 %4496, %v4743_v18   ;;  %v5428_v10 = vpop.permute.xlu1 %2089  ;;  %v5430_v36 = vpop.permute.xlu0 %2085 }
  0xae   : > { %2367 = vperm.xlu0 %4495, %v4816_v45   ;;  %3793 = vmatmul.mubr.msk.bf16.gmra.mrb[64].mxu0 %vm459_vm3, %v5216_v40  ;;  %v6864_v45 = vand.u32 4294901760, %v6844_v11  ;;  %v6869_v11 = vand.u32 4294901760, %v6852_v51  ;;  %v2049_v51 = vlaneseq }
  0xaf   : > { %4191 = vmatmul.mubr.f32.vlgmr.msra.gmra.mrb[0].mxu1 %v6862_v24  ;;  %2770 = vmatprep.mubr.bf16.mxu0 %v6845_v62 }
  0xb0   : > { %4316 = vmatpush3.bf16.msra.mxu1 %v5175_v37  ;;  %4193 = vmatprep.mubr.f32.mxu1 %v6863_v30 }
  0xb1   : > { %2355 = vperm.xlu1 %4496, %v4784_v31   ;;  %v5442_v18 = vpop.permute.xlu1 %2097  ;;  %v5444_v4 = vpop.permute.xlu0 %2093  ;;  %4318 = vmatprep.subr.bf16.mxu1 %v4719_v13  ;;  %v6866_v31 = vand.u32 4294901760, %v6848_v61 }
  0xb2   : > { %2375 = vperm.xlu0 %4495, %v4858_v0   ;;  %v6867_v0 = vand.u32 4294901760, %v6849_v26 }
  0xb3   : > { %4194 = vmatmul.mubr.f32.gmra.mrb[2].mxu1 %v6864_v45 }
  0xb4   : > { %4196 = vmatprep.mubr.f32.mxu1 %v6865_v49 }
  0xb5   : > { %2363 = vperm.xlu1 %4496, %v4792_v34   ;;  %v5453_v37 = vpop.permute.xlu1 %2105  ;;  %v5455_v8 = vpop.permute.xlu0 %2101 }
  0xb6   : > { %2383 = vperm.xlu0 %4495, %v4878_v25   ;;  %3794 = vmatmul.mubr.msk.bf16.gmra.mrb[68].mxu0 %vm459_vm3, %v5231_v12  ;;  %v6868_v25 = vand.u32 4294901760, %v6851_v3 }
  0xb7   : > { %4197 = vmatmul.mubr.f32.gmra.mrb[4].mxu1 %v6866_v31  ;;  %2780 = vmatprep.mubr.bf16.mxu0 %v6845_v62 }
  0xb8   : > { %4199 = vmatprep.mubr.f32.mxu1 %v6867_v0  ;;  %v3057_v0 = vld [vmem:[%s6650_s2 + $0x58] sm:$0xff] }
  0xb9   : > { %2371 = vperm.xlu1 %4496, %v4861_v2   ;;  %v5466_v34 = vpop.permute.xlu1 %2113  ;;  %v5468_v60 = vpop.permute.xlu0 %2109  ;;  %v6870_v2 = vand.u32 4294901760, %v6853_v6 }
  0xba   : > { %2391 = vperm.xlu0 %4495, %v4896_v47   ;;  %v6871_v47 = vand.u32 4294901760, %v6854_v5 }
  0xbb   : > { %4200 = vmatmul.mubr.f32.gmra.mrb[6].mxu1 %v6868_v25  ;;  %v6886_v25 = vld [vmem:[#allocation6_spill] sm:$0xff] }
  0xbc   : > { %4202 = vmatprep.mubr.f32.mxu1 %v6869_v11 }
  0xbd   : > { %2379 = vperm.xlu1 %4496, %v4885_v29   ;;  %v5476_v61 = vpop.permute.xlu1 %2121  ;;  %v5478_v26 = vpop.permute.xlu0 %2117 }
  0xbe   : > { %3795 = vmatmul.mubr.msk.bf16.gmra.mrb[72].mxu0 %vm459_vm3, %v5247_v42  ;;  %2399 = vperm.xlu0 %4495, %v4955_v48   ;;  %v6873_v48 = vand.u32 4294901760, %v6858_v56  ;;  %v6876_v56 = vand.u32 4294901760, %v5073_v33  ;;  %v6878_v33 = vand.u32 4294901760, %v5120_v52 }
  0xbf   : > { %4203 = vmatmul.mubr.f32.gmra.mrb[8].mxu1 %v6870_v2  ;;  %2790 = vmatprep.mubr.bf16.mxu0 %v6845_v62 }
  0xc0   : > { %4205 = vmatprep.mubr.f32.mxu1 %v6871_v47  ;;  %v6889_v47 = vld [vmem:[#allocation5_spill] sm:$0xff] }
  0xc1   : > { %2387 = vperm.xlu1 %4496, %v4919_v63   ;;  %v5489_v29 = vpop.permute.xlu1 %2129  ;;  %v5491_v3 = vpop.permute.xlu0 %2125  ;;  %v5505_v63 = vand.u32 127, %v2049_v51 }
  0xc2   : > { %2407 = vperm.xlu0 %4495, %v6832_v14   ;;  %v6874_v14 = vand.u32 4294901760, %v6859_v59 }
  0xc3   : > { %4206 = vmatmul.mubr.f32.gmra.mrb[10].mxu1 %v6872_v20  ;;  %vm2051_vm4 = vcmp.lt.s32.totalorder %v5505_v63, 64  ;;  %v6890_v20 = vld [vmem:[#allocation18_spill] sm:$0xff] }
  0xc4   : > { %4208 = vmatprep.mubr.f32.mxu1 %v6873_v48 }
  0xc5   : > { %2395 = vperm.xlu1 %4496, %v4958_v23   ;;  %v5499_v6 = vpop.permute.xlu1 %2137  ;;  %v5501_v5 = vpop.permute.xlu0 %2133 }
  0xc6   : > { %3796 = vmatmul.mubr.msk.bf16.gmra.mrb[76].mxu0 %vm459_vm3, %v5262_v17  ;;  %2415 = vperm.xlu0 %4495, %v5066_v28  }
  0xc7   : > { %4209 = vmatmul.mubr.f32.gmra.mrb[12].mxu1 %v6874_v14  ;;  %2800 = vmatprep.mubr.bf16.mxu0 %v6845_v62  ;;  %v6891_v14 = vld [vmem:[#allocation9_spill] sm:$0xff] }
  0xc8   : > { %4211 = vmatprep.mubr.f32.mxu1 %v6875_v44 }
  0xc9   : > { %2403 = vperm.xlu1 %4496, %v6831_v9   ;;  %v6877_v9 = vand.u32 4294901760, %v5089_v54 }
  0xca   : > { %v2146_v23 = vpop.permute.xlu1 %2145  ;;  %2423 = vperm.xlu0 %4495, %v5094_v35  }
  0xcb   : > { %4212 = vmatmul.mubr.f32.gmra.mrb[14].mxu1 %v6876_v56  ;;  %v5521_v28 = vsel %vm2051_vm4, %v5402_v57, %v2146_v23  ;;  %v2142_v59 = vpop.permute.xlu0 %2141  ;;  %v6894_v56 = vld [vmem:[#allocation12_spill] sm:$0xff] }
  0xcc   : > { %v5526_v27 = vsel %vm2051_vm4, %v5392_v41, %v2142_v59  ;;  %4214 = vmatprep.mubr.f32.mxu1 %v6877_v9  ;;  %v6880_v41 = vand.u32 4294901760, %v5154_v21  ;;  %v5568_v21 = vld [vmem:[%s6650_s2 + $0x10] sm:$0xff]  ;;  %v6895_v59 = vld [vmem:[#allocation48_spill] sm:$0xff]  ;;  %vm2493_vm5 = vcmp.lt.f32.partialorder %v5521_v28, 8.0 }
  0xcd   : > { %2411 = vperm.xlu1 %4496, %v5051_v7   ;;  %v6879_v7 = vand.u32 4294901760, %v5128_v50  ;;  %v6882_v50 = vand.u32 4294901760, %v5165_v15  ;;  %vm2492_vm6 = vcmp.lt.f32.partialorder %v5526_v27, 8.0 }
  0xce   : > { %3797 = vmatmul.mubr.msk.bf16.gmra.mrb[80].mxu0 %vm459_vm3, %v5291_v43  ;;  %v2150_v35 = vpop.permute.xlu1 %2149 }
  0xcf   : > { %4215 = vmatmul.mubr.f32.gmra.mrb[16].mxu1 %v6878_v33  ;;  %v5538_v57 = vsel %vm2051_vm4, %v5390_v53, %v2150_v35  ;;  %v2154_v24 = vpop.permute.xlu0 %2153  ;;  %2810 = vmatprep.mubr.bf16.mxu0 %v6845_v62  ;;  %v3065_v33 = vld [vmem:[%s6650_s2 + $0xd8] sm:$0xff] }
  0xd0   : > { %v5544_v54 = vsel %vm2051_vm4, %v5400_v46, %v2154_v24  ;;  %4217 = vmatprep.mubr.f32.mxu1 %v6879_v7  ;;  %v6896_v24 = vld [vmem:[#allocation13_spill] sm:$0xff]  ;;  %vm2494_vm7 = vcmp.lt.f32.partialorder %v5538_v57, 8.0 }
  0xd1   : > { %2419 = vperm.xlu1 %4496, %v5070_v22   ;;  %vm2495_vm8 = vcmp.lt.f32.partialorder %v5544_v54, 8.0 }
  0xd2   : > { %v2158_v52 = vpop.permute.xlu1 %2157 }
  0xd3   : > { %4218 = vmatmul.mubr.f32.gmra.mrb[18].mxu1 %v6880_v41  ;;  %v5554_v53 = vsel %vm2051_vm4, %v5410_v39, %v2158_v52  ;;  %v2162_v30 = vpop.permute.xlu0 %2161  ;;  %v5573_v39 = vld [vmem:[%s6650_s2 + $0x30] sm:$0xff] }
  0xd4   : > { %v5559_v46 = vsel %vm2051_vm4, %v5408_v58, %v2162_v30  ;;  %4220 = vmatprep.mubr.f32.mxu1 %v6882_v50  ;;  %v6883_v58 = vand.u32 4294901760, %v5184_v55  ;;  %v3811_v31 = vcombine.high %v5568_v21, %v5573_v39  ;;  %v6899_v30 = vld [vmem:[#allocation14_spill] sm:$0xff]  ;;  %vm2496_vm9 = vcmp.lt.f32.partialorder %v5554_v53, 8.0 }
  0xd5   : > { %6881 = vst [vmem:[#allocation34_spill] sm:$0xff] %v5559_v46 }
  0xd6   : > { %3798 = vmatmul.mubr.msk.bf16.gmra.mrb[84].mxu0 %vm459_vm3, %v5306_v16  ;;  %v2166_v22 = vpop.permute.xlu1 %2165 }
  0xd7   : > { %4221 = vmatmul.mubr.f32.gmra.mrb[20].mxu1 %v6883_v58  ;;  %v5580_v15 = vsel %vm2051_vm4, %v5421_v1, %v2166_v22  ;;  %v2170_v45 = vpop.permute.xlu0 %2169  ;;  %2853 = vmatprep.mubr.bf16.mxu0 %v6845_v62  ;;  %v3059_v1 = vld [vmem:[%s6650_s2 + $0x78] sm:$0xff]  ;;  %v6900_v58 = vld [vmem:[#allocation24_spill] sm:$0xff] }
  0xd8   : > { %6884 = vst [vmem:[#allocation7_spill] sm:$0xff] %v5580_v15  ;;  %v5586_v49 = vsel %vm2051_vm4, %v5419_v19, %v2170_v45  ;;  %4227 = vmatprep.mubr.f32.mxu1 %v4786_v32  ;;  %v5610_v51 = vcombine.high %v3057_v0, %v3059_v1  ;;  %v5634_v9 = vcombine.low %v3057_v0, %v3059_v1  ;;  %v3069_v45 = vld [vmem:[%s6650_s2 + $0x118] sm:$0xff]  ;;  %v3060_v15 = vld [vmem:[%s6650_s2 + $0x90] sm:$0xff] }
  0xd9   : > { %6885 = vst [vmem:[#allocation10_spill] sm:$0xff] %v5586_v49 }
  0xda   : > { %v2174_v55 = vpop.permute.xlu1 %2173 }
  0xdb   : > { %4228 = vmatmul.mubr.f32.vlgmr.msra.gmra.mrb[0].mxu1 %v6886_v25  ;;  %v5601_v19 = vsel %vm2051_vm4, %v5430_v36, %v2174_v55  ;;  %v2178_v11 = vpop.permute.xlu0 %2177  ;;  %v3061_v36 = vld [vmem:[%s6650_s2 + $0x98] sm:$0xff] }
  0xdc   : > { %6887 = vst [vmem:[#allocation8_spill] sm:$0xff] %v5601_v19  ;;  %4320 = vmatpush3.bf16.msra.mxu1 %v4719_v13  ;;  %v5607_v2 = vsel %vm2051_vm4, %v5428_v10, %v2178_v11  ;;  %4230 = vmatprep.mubr.f32.mxu1 %v6889_v47  ;;  %v3063_v13 = vld [vmem:[%s6650_s2 + $0xb8] sm:$0xff]  ;;  %v6904_v11 = vld [vmem:[#allocation21_spill] sm:$0xff] }
  0xdd   : > { %6888 = vst [vmem:[#allocation11_spill] sm:$0xff] %v5607_v2  ;;  %3172 = vmatprep.subr.bf16.mxu1 %v3811_v31  ;;  %v5637_v35 = vcombine.high %v3061_v36, %v3063_v13  ;;  %v5658_v50 = vcombine.low %v3061_v36, %v3063_v13  ;;  %v6901_v31 = vld [vmem:[#allocation17_spill] sm:$0xff]  ;;  %v6905_v36 = vld [vmem:[#allocation22_spill] sm:$0xff]  ;;  %v3810_v2 = vcombine.low %v5568_v21, %v5573_v39 }
  0xde   : > { %3799 = vmatmul.mubr.msk.bf16.vlgmr.msra.gmra.mrb[88].mxu0 %vm459_vm3, %v6890_v20  ;;  %v2182_v48 = vpop.permute.xlu1 %2181 }
  0xdf   : > { %4231 = vmatmul.mubr.f32.gmra.mrb[2].mxu1 %v6891_v14  ;;  %v5624_v10 = vsel %vm2051_vm4, %v5444_v4, %v2182_v48  ;;  %v2186_v44 = vpop.permute.xlu0 %2185  ;;  %2863 = vmatprep.mubr.bf16.mxu0 %v6845_v62 }
  0xe0   : > { %6892 = vst [vmem:[#allocation15_spill] sm:$0xff] %v5624_v10  ;;  %v5630_v23 = vsel %vm2051_vm4, %v5442_v18, %v2186_v44  ;;  %4233 = vmatprep.mubr.f32.mxu1 %v6894_v56  ;;  %3316 = vmatpush1.bf16.msra.mxu0 %v6895_v59  ;;  %v3067_v18 = vld [vmem:[%s6650_s2 + $0xf8] sm:$0xff] }
  0xe1   : > { %6893 = vst [vmem:[#allocation16_spill] sm:$0xff] %v5630_v23  ;;  %3317 = vmatprep.subr.bf16.mxu0 %v5610_v51  ;;  %v5661_v22 = vcombine.high %v3065_v33, %v3067_v18  ;;  %v5685_v20 = vcombine.low %v3065_v33, %v3067_v18  ;;  %v6927_v23 = vld [vmem:[#allocation46_spill] sm:$0xff] }
  0xe2   : > { %v2190_v4 = vpop.permute.xlu1 %2189 }
  0xe3   : > { %4234 = vmatmul.mubr.f32.gmra.mrb[4].mxu1 %v6896_v24  ;;  %v5649_v7 = vsel %vm2051_vm4, %v5455_v8, %v2190_v4  ;;  %v2194_v52 = vpop.permute.xlu0 %2193  ;;  %v6908_v4 = vld [vmem:[#allocation26_spill] sm:$0xff] }
  0xe4   : > { %6897 = vst [vmem:[#allocation19_spill] sm:$0xff] %v5649_v7  ;;  %v5654_v41 = vsel %vm2051_vm4, %v5453_v37, %v2194_v52  ;;  %4236 = vmatprep.mubr.f32.mxu1 %v6899_v30  ;;  %3318 = vmatpush1.bf16.msra.mxu0 %v5634_v9  ;;  %v3071_v37 = vld [vmem:[%s6650_s2 + $0x138] sm:$0xff]  ;;  %v3058_v7 = vld [vmem:[%s6650_s2 + $0x70] sm:$0xff] }
  0xe5   : > { %6898 = vst [vmem:[#allocation20_spill] sm:$0xff] %v5654_v41  ;;  %3319 = vmatprep.subr.bf16.mxu0 %v5637_v35  ;;  %v5688_v48 = vcombine.high %v3069_v45, %v3071_v37  ;;  %v5703_v33 = vcombine.low %v3069_v45, %v3071_v37  ;;  %v6913_v45 = vld [vmem:[#allocation31_spill] sm:$0xff] }
  0xe6   : > { %3800 = vmatmul.mubr.msk.bf16.gmra.mrb[92].mxu0 %vm459_vm3, %v6900_v58  ;;  %v2198_v8 = vpop.permute.xlu1 %2197 }
  0xe7   : > { %4237 = vmatmul.mubr.f32.gmra.mrb[6].mxu1 %v6901_v31  ;;  %v5675_v55 = vsel %vm2051_vm4, %v5468_v60, %v2198_v8  ;;  %v2202_v0 = vpop.permute.xlu0 %2201  ;;  %2873 = vmatprep.mubr.bf16.mxu0 %v6845_v62  ;;  %v6912_v8 = vld [vmem:[#allocation30_spill] sm:$0xff] }
  0xe8   : > { %6902 = vst [vmem:[#allocation23_spill] sm:$0xff] %v5675_v55  ;;  %v5681_v1 = vsel %vm2051_vm4, %v5466_v34, %v2202_v0  ;;  %4239 = vmatprep.mubr.f32.mxu1 %v6904_v11  ;;  %3320 = vmatpush1.bf16.msra.mxu0 %v5658_v50 }
  0xe9   : > { %6903 = vst [vmem:[#allocation25_spill] sm:$0xff] %v5681_v1  ;;  %3321 = vmatprep.subr.bf16.mxu0 %v5661_v22  ;;  %v6926_v1 = vld [vmem:[#allocation44_spill] sm:$0xff] }
  0xea   : > { %v2206_v60 = vpop.permute.xlu1 %2205 }
  0xeb   : > { %4240 = vmatmul.mubr.f32.gmra.mrb[8].mxu1 %v6905_v36  ;;  %v5694_v13 = vsel %vm2051_vm4, %v5478_v26, %v2206_v60  ;;  %v2210_v34 = vpop.permute.xlu0 %2209  ;;  %v6909_v26 = vld [vmem:[#allocation27_spill] sm:$0xff]  ;;  %v6917_v60 = vld [vmem:[#allocation45_spill] sm:$0xff] }
  0xec   : > { %6906 = vst [vmem:[#allocation28_spill] sm:$0xff] %v5694_v13  ;;  %v5699_v44 = vsel %vm2051_vm4, %v5476_v61, %v2210_v34  ;;  %4242 = vmatprep.mubr.f32.mxu1 %v6908_v4  ;;  %3322 = vmatpush1.bf16.msra.mxu0 %v5685_v20  ;;  %v6918_v34 = vld [vmem:[#allocation37_spill] sm:$0xff] }
  0xed   : > { %6907 = vst [vmem:[#allocation40_spill] sm:$0xff] %v5699_v44  ;;  %3323 = vmatprep.subr.bf16.mxu0 %v5688_v48 }
  0xee   : > { %3801 = vmatmul.mubr.msk.bf16.gmra.mrb[96].mxu0 %vm459_vm3, %v6855_v38  ;;  %v2214_v18 = vpop.permute.xlu1 %2213 }
  0xef   : > { %4243 = vmatmul.mubr.f32.gmra.mrb[10].mxu1 %v6909_v26  ;;  %v5712_v52 = vsel %vm2051_vm4, %v5491_v3, %v2214_v18  ;;  %v2218_v61 = vpop.permute.xlu0 %2217  ;;  %2883 = vmatprep.mubr.bf16.mxu0 %v6845_v62 }
  0xf0   : > { %6910 = vst [vmem:[#allocation29_spill] sm:$0xff] %v5712_v52  ;;  %v5718_v58 = vsel %vm2051_vm4, %v5489_v29, %v2218_v61  ;;  %4245 = vmatprep.mubr.f32.mxu1 %v6912_v8  ;;  %3324 = vmatpush1.bf16.msra.mxu0 %v5703_v33  ;;  %v6916_v29 = vld [vmem:[#allocation36_spill] sm:$0xff] }
  0xf1   : > { %6911 = vst [vmem:[#allocation33_spill] sm:$0xff] %v5718_v58  ;;  %v6924_v58 = vld [vmem:[#allocation43_spill] sm:$0xff] }
  0xf2   : > { %v2222_v38 = vpop.permute.xlu1 %2221 }
  0xf3   : > { %4246 = vmatmul.mubr.f32.gmra.mrb[12].mxu1 %v6913_v45  ;;  %v5726_v3 = vsel %vm2051_vm4, %v5501_v5, %v2222_v38  ;;  %v2226_v37 = vpop.permute.xlu0 %2225  ;;  %v6919_v5 = vld [vmem:[#allocation39_spill] sm:$0xff]  ;;  %v6920_v38 = vld [vmem:[#allocation41_spill] sm:$0xff] }
  0xf4   : > { %6914 = vst [vmem:[#allocation35_spill] sm:$0xff] %v5726_v3  ;;  %v5731_v0 = vsel %vm2051_vm4, %v5499_v6, %v2226_v37  ;;  %4248 = vmatprep.mubr.f32.mxu1 %v6916_v29  ;;  %v6922_v37 = vld [vmem:[#allocation42_spill] sm:$0xff] }
  0xf5   : > { %6915 = vst [vmem:[#allocation38_spill] sm:$0xff] %v5731_v0  ;;  %v6923_v0 = vld [vmem:[#allocation47_spill] sm:$0xff] }
  0xf6   : > { %3802 = vmatmul.mubr.msk.bf16.gmra.mrb[100].mxu0 %vm459_vm3, %v6917_v60 }
  0xf7   : > { %4249 = vmatmul.mubr.f32.gmra.mrb[14].mxu1 %v6918_v34  ;;  %v5737_v18 = vpop.permute.xlu1 %2251  ;;  %2893 = vmatprep.mubr.bf16.mxu0 %v6845_v62 }
  0xf8   : > { %v5740_v61 = vpop.permute.xlu0 %2255  ;;  %4251 = vmatprep.mubr.f32.mxu1 %v6919_v5 }
  0xfb   : > { %4252 = vmatmul.mubr.f32.gmra.mrb[16].mxu1 %v6920_v38  ;;  %v5744_v3 = vpop.permute.xlu1 %2259 }
  0xfc   : > { %v5746_v6 = vpop.permute.xlu0 %2267  ;;  %4254 = vmatprep.mubr.f32.mxu1 %v6922_v37 }
  0xfd   : > { %6921 = vst [vmem:[#allocation6_spill] sm:$0xff] %v5746_v6  ;;  %v3066_v6 = vld [vmem:[%s6650_s2 + $0xf0] sm:$0xff] }
  0xfe   : > { %3803 = vmatmul.mubr.msk.bf16.gmra.mrb[104].mxu0 %vm459_vm3, %v6923_v0  ;;  %v5751_v60 = vpop.f32.mrb[0].mxu0  ;;  %v3056_v0 = vld [vmem:[%s6650_s2 + $0x50] sm:$0xff] }
  0xff   : > { %4255 = vmatmul.mubr.f32.gmra.mrb[18].mxu1 %v6924_v58  ;;  %v5754_v52 = vpop.permute.xlu1 %2263  ;;  %2903 = vmatprep.mubr.bf16.mxu0 %v6845_v62  ;;  %v4033_v44 = vpop.f32.mrb[1].mxu0 }
 0x100   : > { %v5757_v13 = vpop.permute.xlu0 %2275  ;;  %4257 = vmatprep.mubr.f32.mxu1 %v6926_v1  ;;  %v5760_v55 = vpop.f32.mrb[2].mxu0 }
 0x101   : > { %6925 = vst [vmem:[#allocation5_spill] sm:$0xff] %v5757_v13  ;;  %v4034_v41 = vpop.f32.mrb[3].mxu0  ;;  %v3062_v13 = vld [vmem:[%s6650_s2 + $0xb0] sm:$0xff] }
 0x102   : > { %v3815_v41 = vcombine.high %v3056_v0, %v3058_v7  ;;  %v3819_v46 = vcombine.high %v3060_v15, %v3062_v13 }
 0x103   : > { %4258 = vmatmul.mubr.f32.gmra.mrb[20].mxu1 %v6927_v23  ;;  %v5769_v10 = vpop.permute.xlu1 %2271 }
 0x104   : > { %v5771_v44 = vpop.permute.xlu0 %2283  ;;  %4264 = vmatprep.mubr.f32.mxu1 %v4786_v32 }
 0x105   : > { %6928 = vst [vmem:[#allocation18_spill] sm:$0xff] %v5771_v44 }
 0x106   : > { %3804 = vmatmul.mubr.msk.bf16.gmra.mrb[108].mxu0 %vm459_vm3, %v5216_v40  ;;  %v3814_v40 = vcombine.low %v3056_v0, %v3058_v7  ;;  %v3068_v0 = vld [vmem:[%s6650_s2 + $0x110] sm:$0xff] }
 0x107   : > { %v5778_v19 = vpop.f32.mrb[4].mxu0  ;;  %4265 = vmatmul.mubr.f32.vlgmr.msra.gmra.mrb[0].mxu1 %v6886_v25  ;;  %v5787_v32 = vpop.permute.xlu1 %2279  ;;  %2913 = vmatprep.mubr.bf16.mxu0 %v6845_v62  ;;  %v3064_v25 = vld [vmem:[%s6650_s2 + $0xd0] sm:$0xff] }
 0x108   : > { %v4037_v21 = vpop.f32.mrb[5].mxu0  ;;  %3173 = vmatpush1.bf16.msra.mxu1 %v3810_v2  ;;  %v5790_v39 = vpop.permute.xlu0 %2291  ;;  %4267 = vmatprep.mubr.f32.mxu1 %v6889_v47  ;;  %v3818_v47 = vcombine.low %v3060_v15, %v3062_v13  ;;  %v3822_v13 = vcombine.low %v3064_v25, %v3066_v6 }
 0x109   : > { %v5793_v44 = vpop.f32.mrb[6].mxu0  ;;  %3174 = vmatprep.subr.bf16.mxu1 %v3815_v41 }
 0x10a   : > { %v4038_v49 = vpop.f32.mrb[7].mxu0 }
 0x10b   : > { %4268 = vmatmul.mubr.f32.gmra.mrb[2].mxu1 %v6891_v14  ;;  %v5802_v2 = vpop.permute.xlu1 %2287  ;;  %v3823_v49 = vcombine.high %v3064_v25, %v3066_v6  ;;  %v3070_v14 = vld [vmem:[%s6650_s2 + $0x130] sm:$0xff] }
 0x10c   : > { %6929 = vst [vmem:[#allocation9_spill] sm:$0xff] %v5802_v2  ;;  %v5804_v21 = vpop.permute.xlu0 %2299  ;;  %4270 = vmatprep.mubr.f32.mxu1 %v6894_v56  ;;  %3175 = vmatpush1.bf16.msra.mxu1 %v3814_v40  ;;  %v3827_v40 = vcombine.high %v3068_v0, %v3070_v14 }
 0x10d   : > { %3176 = vmatprep.subr.bf16.mxu1 %v3819_v46 }
 0x10e   : > { %3805 = vmatmul.mubr.msk.bf16.gmra.mrb[112].mxu0 %vm459_vm3, %v5231_v12 }
 0x10f   : > { %v5809_v7 = vpop.f32.mrb[8].mxu0  ;;  %4271 = vmatmul.mubr.f32.gmra.mrb[4].mxu1 %v6896_v24  ;;  %v5818_v56 = vpop.permute.xlu1 %2295  ;;  %2923 = vmatprep.mubr.bf16.mxu0 %v6845_v62 }
 0x110   : > { %v4041_v46 = vpop.f32.mrb[9].mxu0  ;;  %v5821_v15 = vpop.permute.xlu0 %2307  ;;  %4273 = vmatprep.mubr.f32.mxu1 %v6899_v30  ;;  %3177 = vmatpush1.bf16.msra.mxu1 %v3818_v47 }
 0x111   : > { %v5824_v12 = vpop.f32.mrb[10].mxu0  ;;  %3178 = vmatprep.subr.bf16.mxu1 %v3823_v49  ;;  %v3826_v46 = vcombine.low %v3068_v0, %v3070_v14  ;;  %v6930_v49 = vld [vmem:[#allocation32_spill] sm:$0xff] }
 0x112   : > { %v4042_v41 = vpop.f32.mrb[11].mxu0 }
 0x113   : > { %4274 = vmatmul.mubr.f32.gmra.mrb[6].mxu1 %v6901_v31  ;;  %v5827_v2 = vpop.permute.xlu1 %2303 }
 0x114   : > { %v5829_v24 = vpop.permute.xlu0 %2315  ;;  %4276 = vmatprep.mubr.f32.mxu1 %v6904_v11  ;;  %3179 = vmatpush1.bf16.msra.mxu1 %v3822_v13 }
 0x115   : > { %3180 = vmatprep.subr.bf16.mxu1 %v3827_v40 }
 0x116   : > { %3806 = vmatmul.mubr.msk.bf16.gmra.mrb[116].mxu0 %vm459_vm3, %v5247_v42 }
 0x117   : > { %v5834_v30 = vpop.f32.mrb[12].mxu0  ;;  %4277 = vmatmul.mubr.f32.gmra.mrb[8].mxu1 %v6905_v36  ;;  %v5837_v6 = vpop.permute.xlu1 %2311  ;;  %2933 = vmatprep.mubr.bf16.mxu0 %v6845_v62 }
 0x118   : > { %v4045_v31 = vpop.f32.mrb[13].mxu0  ;;  %v5840_v25 = vpop.permute.xlu0 %2323  ;;  %4279 = vmatprep.mubr.f32.mxu1 %v6908_v4  ;;  %3181 = vmatpush1.bf16.msra.mxu1 %v3826_v46 }
 0x119   : > { %v5843_v11 = vpop.f32.mrb[14].mxu0  ;;  %4321 = vmatprep.subr.bf16.mxu1 %v6930_v49 }
 0x11a   : > { %v4046_v47 = vpop.f32.mrb[15].mxu0 }
 0x11b   : > { %4280 = vmatmul.mubr.f32.gmra.mrb[10].mxu1 %v6909_v26  ;;  %v5847_v42 = vpop.permute.xlu1 %2319 }
 0x11c   : > { %v5849_v36 = vpop.permute.xlu0 %2331  ;;  %4282 = vmatprep.mubr.f32.mxu1 %v6912_v8 }
 0x11e   : > { %3807 = vmatmul.mubr.msk.bf16.gmra.mrb[120].mxu0 %vm459_vm3, %v5262_v17 }
 0x11f   : > { %4283 = vmatmul.mubr.f32.gmra.mrb[12].mxu1 %v6913_v45  ;;  %v5855_v4 = vpop.permute.xlu1 %2327  ;;  %2943 = vmatprep.mubr.bf16.mxu0 %v6845_v62 }
 0x120   : > { %4285 = vmatprep.mubr.f32.mxu1 %v6916_v29  ;;  %v5859_v0 = vpop.f32.mrb[16].mxu0 }
 0x121   : > { %v5861_v26 = vpop.permute.xlu0 %2339  ;;  %v4049_v14 = vpop.f32.mrb[17].mxu0 }
 0x122   : > { %v5863_v13 = vpop.f32.mrb[18].mxu0  ;;  %v4513_v14 = vld [vmem:[%s4777_s9] sm:$0xff]  }
 0x123   : > { %4286 = vmatmul.mubr.f32.gmra.mrb[14].mxu1 %v6918_v34  ;;  %v5866_v8 = vpop.permute.xlu1 %2335  ;;  %v4050_v17 = vpop.f32.mrb[19].mxu0 }
 0x124   : > { %4288 = vmatprep.mubr.f32.mxu1 %v6919_v5 }
 0x125   : > { %v5869_v45 = vpop.permute.xlu0 %2351 }
 0x126   : > { %3808 = vmatmul.mubr.msk.bf16.gmra.mrb[124].mxu0 %vm459_vm3, %v5291_v43 }
 0x127   : > { %4289 = vmatmul.mubr.f32.gmra.mrb[16].mxu1 %v6920_v38  ;;  %2953 = vmatprep.mubr.bf16.mxu0 %v6845_v62 }
 0x128   : > { %v5875_v29 = vpop.permute.xlu1 %2343  ;;  %4291 = vmatprep.mubr.f32.mxu1 %v6922_v37  ;;  %v567_v41 = vpop.f32.mrb[20].mxu0 }
 0x129   : > { %v5878_v34 = vpop.permute.xlu0 %2359  ;;  %v4053_v40 = vpop.f32.mrb[21].mxu0 }
 0x12a   : > { %v570_v46 = vpop.f32.mrb[22].mxu0 }
 0x12b   : > { %4292 = vmatmul.mubr.f32.gmra.mrb[18].mxu1 %v6924_v58  ;;  %v4054_v5 = vpop.f32.mrb[23].mxu0 }
 0x12c   : > { %v5881_v31 = vpop.permute.xlu1 %2347  ;;  %4294 = vmatprep.mubr.f32.mxu1 %v6926_v1 }
 0x12d   : > { %v5884_v43 = vpop.permute.xlu0 %2367 }
 0x12e   : > { %3809 = vmatmul.mubr.msk.bf16.gmra.mrb[128].mxu0 %vm459_vm3, %v5306_v16  ;;  %v2433_v28 = vsel %vm2051_vm4, %v5787_v32, %v5884_v43 }
 0x12f   : > { %4295 = vmatmul.mubr.f32.gmra.mrb[20].mxu1 %v6927_v23  ;;  %3347 = vmatprep.mubr.bf16.mxu0 %v6845_v62 }
 0x130   : > { %v5890_v38 = vpop.permute.xlu1 %2355  ;;  %3204 = vmatprep.mubr.bf16.mxu1 %v6845_v62  ;;  %v575_v37 = vpop.f32.mrb[24].mxu0 }
 0x131   : > { %v5893_v58 = vpop.permute.xlu0 %2375  ;;  %v4057_v47 = vpop.f32.mrb[25].mxu0 }
 0x132   : > { %v578_v49 = vpop.f32.mrb[26].mxu0 }
 0x133   : > { %3830 = vmatmul.mubr.msk.bf16.vlgmr.msra.gmra.mrb[24].mxu1 %vm459_vm3, %v4513_v14  ;;  %v4058_v1 = vpop.f32.mrb[27].mxu0 }
 0x134   : > { %4326 = vmatpush1.bf16.msra.mxu1 %v6895_v59  ;;  %v5898_v16 = vpop.permute.xlu1 %2363  ;;  %3214 = vmatprep.mubr.bf16.mxu1 %v6845_v62 }
 0x135   : > { %v2384_v23 = vpop.permute.xlu0 %2383  ;;  %4322 = vmatprep.subr.bf16.mxu1 %v5610_v51 }
 0x136   : > { %v2437_v17 = vsel %vm2051_vm4, %v5818_v56, %v2384_v23  ;;  %3841 = vmatmul.mubr.msk.bf16.vlgmr.msra.gmra.mrb[132].mxu0 %vm459_vm3, %v4513_v14  ;;  %v4514_v23 = vld [vmem:[%s4777_s9 + $0x8] sm:$0xff]  }
 0x137   : > { %v5906_v40 = vmul.f32 %v2437_v17, %v570_v46  ;;  %3357 = vmatprep.mubr.bf16.mxu0 %v6845_v62 }
 0x138   : > { %v5909_v5 = vpop.permute.xlu1 %2371  ;;  %v583_v59 = vpop.f32.mrb[28].mxu0  ;;  %4327 = vmatpush1.bf16.msra.mxu1 %v5634_v9 }
 0x139   : > { %6931 = vst [vmem:[#allocation12_spill] sm:$0xff] %v5906_v40  ;;  %v2392_v47 = vpop.permute.xlu0 %2391  ;;  %v4061_v1 = vpop.f32.mrb[29].mxu0  ;;  %4323 = vmatprep.subr.bf16.mxu1 %v5637_v35 }
 0x13a   : > { %v2439_v51 = vsel %vm2051_vm4, %v5827_v2, %v2392_v47  ;;  %v586_v56 = vpop.f32.mrb[30].mxu0 }
 0x13b   : > { %3831 = vmatmul.mubr.msk.bf16.gmra.mrb[28].mxu1 %vm459_vm3, %v4514_v23  ;;  %v5918_v46 = vmul.f32 %v2439_v51, %v578_v49  ;;  %v4062_v14 = vpop.f32.mrb[31].mxu0 }
 0x13c   : > { %v2380_v17 = vpop.permute.xlu1 %2379  ;;  %3224 = vmatprep.mubr.bf16.mxu1 %v6845_v62  ;;  %4328 = vmatpush1.bf16.msra.mxu1 %v5658_v50 }
 0x13d   : > { %6932 = vst [vmem:[#allocation48_spill] sm:$0xff] %v5918_v46  ;;  %v2436_v9 = vsel %vm2051_vm4, %v5790_v39, %v2380_v17  ;;  %v2400_v35 = vpop.permute.xlu0 %2399  ;;  %4324 = vmatprep.subr.bf16.mxu1 %v5661_v22 }
 0x13e   : > { %3842 = vmatmul.mubr.msk.bf16.gmra.mrb[136].mxu0 %vm459_vm3, %v4514_v23  ;;  %v2441_v2 = vsel %vm2051_vm4, %v5837_v6, %v2400_v35  ;;  %v5930_v49 = vmul.f32 %v2436_v9, %v567_v41 }
 0x13f   : > { %v5932_v47 = vmul.f32 %v2441_v2, %v586_v56  ;;  %3367 = vmatprep.mubr.bf16.mxu0 %v6845_v62  ;;  %v4515_v56 = vld [vmem:[%s4777_s9 + $0x10] sm:$0xff]  }
 0x140   : > { %6933 = vst [vmem:[#allocation13_spill] sm:$0xff] %v5930_v49  ;;  %v2388_v50 = vpop.permute.xlu1 %2387  ;;  %v591_v1 = vpop.f32.mrb[32].mxu0  ;;  %4329 = vmatpush1.bf16.msra.mxu1 %v5685_v20 }
 0x141   : > { %6934 = vst [vmem:[#allocation14_spill] sm:$0xff] %v5932_v47  ;;  %v2438_v22 = vsel %vm2051_vm4, %v5804_v21, %v2388_v50  ;;  %v4065_v39 = vpop.f32.mrb[33].mxu0  ;;  %v2408_v51 = vpop.permute.xlu0 %2407  ;;  %4325 = vmatprep.subr.bf16.mxu1 %v5688_v48 }
 0x142   : > { %v594_v23 = vpop.f32.mrb[34].mxu0  ;;  %v2443_v6 = vsel %vm2051_vm4, %v5847_v42, %v2408_v51  ;;  %v5943_v41 = vmul.f32 %v2438_v22, %v575_v37  ;;  %v4516_v22 = vld [vmem:[%s4777_s9 + $0x18] sm:$0xff]  }
 0x143   : > { %3832 = vmatmul.mubr.msk.bf16.gmra.mrb[32].mxu1 %vm459_vm3, %v4515_v56  ;;  %v5947_v14 = vmul.f32 %v2443_v6, %v594_v23  ;;  %v4066_v20 = vpop.f32.mrb[35].mxu0 }
 0x144   : > { %6935 = vst [vmem:[#allocation24_spill] sm:$0xff] %v5943_v41  ;;  %v2396_v17 = vpop.permute.xlu1 %2395  ;;  %3234 = vmatprep.mubr.bf16.mxu1 %v6845_v62  ;;  %4330 = vmatpush1.bf16.msra.mxu1 %v5703_v33 }
 0x145   : > { %6936 = vst [vmem:[#allocation17_spill] sm:$0xff] %v5947_v14  ;;  %v2440_v48 = vsel %vm2051_vm4, %v5821_v15, %v2396_v17  ;;  %v2416_v21 = vpop.permute.xlu0 %2415 }
 0x146   : > { %3843 = vmatmul.mubr.msk.bf16.gmra.mrb[140].mxu0 %vm459_vm3, %v4515_v56  ;;  %v5955_v42 = vmul.f32 %v2440_v48, %v583_v59  ;;  %v2445_v35 = vsel %vm2051_vm4, %v5855_v4, %v2416_v21  ;;  %v4517_v21 = vld [vmem:[%s4777_s9 + $0x20] sm:$0xff]  }
 0x147   : > { %3377 = vmatprep.mubr.bf16.mxu0 %v6845_v62 }
 0x148   : > { %6937 = vst [vmem:[#allocation21_spill] sm:$0xff] %v5955_v42  ;;  %v2404_v37 = vpop.permute.xlu1 %2403  ;;  %v599_v9 = vpop.f32.mrb[36].mxu0 }
 0x149   : > { %v2442_v33 = vsel %vm2051_vm4, %v5829_v24, %v2404_v37  ;;  %v4069_v2 = vpop.f32.mrb[37].mxu0  ;;  %v2424_v23 = vpop.permute.xlu0 %2423 }
 0x14a   : > { %v602_v50 = vpop.f32.mrb[38].mxu0  ;;  %v5964_v15 = vmul.f32 %v2442_v33, %v591_v1  ;;  %v2447_v56 = vsel %vm2051_vm4, %v5866_v8, %v2424_v23 }
 0x14b   : > { %3833 = vmatmul.mubr.msk.bf16.gmra.mrb[36].mxu1 %vm459_vm3, %v4516_v22  ;;  %v5968_v59 = vmul.f32 %v2445_v35, %v602_v50  ;;  %v4070_v39 = vpop.f32.mrb[39].mxu0 }
 0x14c   : > { %6938 = vst [vmem:[#allocation22_spill] sm:$0xff] %v5964_v15  ;;  %3244 = vmatprep.mubr.bf16.mxu1 %v6845_v62  ;;  %v2412_v51 = vpop.permute.xlu1 %2411  ;;  %v4519_v39 = vld [vmem:[%s4777_s9 + $0x30] sm:$0xff]  }
 0x14d   : > { %6939 = vst [vmem:[#allocation26_spill] sm:$0xff] %v5968_v59  ;;  %v2444_v4 = vsel %vm2051_vm4, %v5840_v25, %v2412_v51  ;;  %v4523_v15 = vld [vmem:[%s4777_s9 + $0x50] sm:$0xff]  }
 0x14e   : > { %3844 = vmatmul.mubr.msk.bf16.gmra.mrb[144].mxu0 %vm459_vm3, %v4516_v22  ;;  %v5975_v24 = vmul.f32 %v2444_v4, %v599_v9 }
 0x14f   : > { %3387 = vmatprep.mubr.bf16.mxu0 %v6845_v62 }
 0x150   : > { %6940 = vst [vmem:[#allocation27_spill] sm:$0xff] %v5975_v24  ;;  %v607_v1 = vpop.f32.mrb[40].mxu0  ;;  %v2420_v6 = vpop.permute.xlu1 %2419 }
 0x151   : > { %v4073_v20 = vpop.f32.mrb[41].mxu0  ;;  %v2446_v17 = vsel %vm2051_vm4, %v5849_v36, %v2420_v6  ;;  %v4518_v36 = vld [vmem:[%s4777_s9 + $0x28] sm:$0xff]   ;;  %v4520_v6 = vld [vmem:[%s4777_s9 + $0x38] sm:$0xff]  }
 0x152   : > { %v610_v25 = vpop.f32.mrb[42].mxu0  ;;  %v5984_v48 = vmul.f32 %v2446_v17, %v607_v1 }
 0x153   : > { %3834 = vmatmul.mubr.msk.bf16.gmra.mrb[40].mxu1 %vm459_vm3, %v4517_v21  ;;  %v5988_v37 = vmul.f32 %v2447_v56, %v610_v25  ;;  %v4074_v9 = vpop.f32.mrb[43].mxu0 }
 0x154   : > { %6941 = vst [vmem:[#allocation30_spill] sm:$0xff] %v5984_v48  ;;  %3254 = vmatprep.mubr.bf16.mxu1 %v6845_v62  ;;  %v4522_v48 = vld [vmem:[%s4777_s9 + $0x48] sm:$0xff]  }
 0x155   : > { %6942 = vst [vmem:[#allocation31_spill] sm:$0xff] %v5988_v37 }
 0x156   : > { %3845 = vmatmul.mubr.msk.bf16.gmra.mrb[148].mxu0 %vm459_vm3, %v4517_v21  ;;  %v4521_v21 = vld [vmem:[%s4777_s9 + $0x40] sm:$0xff]   ;;  %s283_s9 = sand.u32 1, %s4578_s22  }
 0x157   : > { %3397 = vmatprep.mubr.bf16.mxu0 %v6845_v62  ;;  %s4441_s26 = smul.u32 176, %s283_s9  ;;  %s6587_s10 = scalar_lea.sflag [#allocation3], %s283_s9 }
 0x159   : > { %v5993_v8 = vpop.f32.mrb[44].mxu0  ;;  %s6503_s29 = scalar_lea.vmem [#allocation2], %s4441_s26 }
 0x15a   : > { %v5995_v35 = vpop.f32.mrb[45].mxu0 }
 0x15b   : > { %3835 = vmatmul.mubr.msk.bf16.gmra.mrb[44].mxu1 %vm459_vm3, %v4518_v36  ;;  %v5999_v33 = vpop.f32.mrb[46].mxu0 }
 0x15c   : > { %3264 = vmatprep.mubr.bf16.mxu1 %v6845_v62  ;;  %v6002_v2 = vpop.f32.mrb[47].mxu0 }
 0x15e   : > { %3846 = vmatmul.mubr.msk.bf16.gmra.mrb[152].mxu0 %vm459_vm3, %v4518_v36 }
 0x15f   : > { %3407 = vmatprep.mubr.bf16.mxu0 %v6845_v62 }
 0x161   : > { %v6006_v50 = vpop.f32.mrb[48].mxu0 }
 0x162   : > { %v6008_v22 = vpop.f32.mrb[49].mxu0 }
 0x163   : > { %3836 = vmatmul.mubr.msk.bf16.gmra.mrb[48].mxu1 %vm459_vm3, %v4519_v39  ;;  %v6012_v51 = vpop.f32.mrb[50].mxu0 }
 0x164   : > { %3274 = vmatprep.mubr.bf16.mxu1 %v6845_v62  ;;  %v6015_v4 = vpop.f32.mrb[51].mxu0 }
 0x166   : > { %3847 = vmatmul.mubr.msk.bf16.gmra.mrb[156].mxu0 %vm459_vm3, %v4519_v39 }
 0x167   : > { %3417 = vmatprep.mubr.bf16.mxu0 %v6845_v62 }
 0x169   : > { %v6019_v23 = vpop.f32.mrb[52].mxu0 }
 0x16a   : > { %v6021_v1 = vpop.f32.mrb[53].mxu0 }
 0x16b   : > { %3837 = vmatmul.mubr.msk.bf16.gmra.mrb[52].mxu1 %vm459_vm3, %v4520_v6  ;;  %v6025_v56 = vpop.f32.mrb[54].mxu0 }
 0x16c   : > { %3284 = vmatprep.mubr.bf16.mxu1 %v6845_v62  ;;  %v6028_v20 = vpop.f32.mrb[55].mxu0 }
 0x16e   : > { %3848 = vmatmul.mubr.msk.bf16.gmra.mrb[160].mxu0 %vm459_vm3, %v4520_v6 }
 0x16f   : > { %3427 = vmatprep.mubr.bf16.mxu0 %v6845_v62 }
 0x171   : > { %v6032_v17 = vpop.f32.mrb[56].mxu0 }
 0x172   : > { %6943 = vst [vmem:[#allocation36_spill] sm:$0xff] %v6032_v17  ;;  %v6034_v25 = vpop.f32.mrb[57].mxu0 }
 0x173   : > { %6944 = vst [vmem:[#allocation45_spill] sm:$0xff] %v6034_v25  ;;  %3838 = vmatmul.mubr.msk.bf16.gmra.mrb[56].mxu1 %vm459_vm3, %v4521_v21  ;;  %v6038_v9 = vpop.f32.mrb[58].mxu0 }
 0x174   : > { %3294 = vmatprep.mubr.bf16.mxu1 %v6845_v62  ;;  %v6041_v36 = vpop.f32.mrb[59].mxu0 }
 0x175   : > { %6945 = vst [vmem:[#allocation37_spill] sm:$0xff] %v6041_v36 }
 0x176   : > { %3849 = vmatmul.mubr.msk.bf16.gmra.mrb[164].mxu0 %vm459_vm3, %v4521_v21 }
 0x177   : > { %3437 = vmatprep.mubr.bf16.mxu0 %v6845_v62 }
 0x179   : > { %v6045_v39 = vpop.f32.mrb[60].mxu0 }
 0x17a   : > { %6946 = vst [vmem:[#allocation39_spill] sm:$0xff] %v6045_v39  ;;  %v6047_v6 = vpop.f32.mrb[61].mxu0 }
 0x17b   : > { %6947 = vst [vmem:[#allocation41_spill] sm:$0xff] %v6047_v6  ;;  %3839 = vmatmul.mubr.msk.bf16.gmra.mrb[60].mxu1 %vm459_vm3, %v4522_v48  ;;  %v6051_v37 = vpop.f32.mrb[62].mxu0 }
 0x17c   : > { %6948 = vst [vmem:[#allocation42_spill] sm:$0xff] %v6051_v37  ;;  %3304 = vmatprep.mubr.bf16.mxu1 %v6845_v62  ;;  %v6054_v24 = vpop.f32.mrb[63].mxu0 }
 0x17d   : > { %6949 = vst [vmem:[#allocation47_spill] sm:$0xff] %v6054_v24 }
 0x17e   : > { %3850 = vmatmul.mubr.msk.bf16.gmra.mrb[168].mxu0 %vm459_vm3, %v4522_v48 }
 0x181   : > { %v6057_v59 = vpop.f32.mrb[64].mxu0 }
 0x182   : > { %6950 = vst [vmem:[#allocation43_spill] sm:$0xff] %v6057_v59  ;;  %v6059_v21 = vpop.f32.mrb[65].mxu0 }
 0x183   : > { %6951 = vst [vmem:[#allocation44_spill] sm:$0xff] %v6059_v21  ;;  %3840 = vmatmul.mubr.msk.bf16.gmra.mrb[64].mxu1 %vm459_vm3, %v4523_v15  ;;  %v6063_v14 = vpop.f32.mrb[66].mxu0 }
 0x184   : > { %6952 = vst [vmem:[#allocation46_spill] sm:$0xff] %v6063_v14  ;;  %3447 = vmatprep.mubr.bf16.mxu1 %v6845_v62  ;;  %v6066_v42 = vpop.f32.mrb[67].mxu0 }
 0x185   : > { %6953 = vst [vmem:[#allocation32_spill] sm:$0xff] %v6066_v42 }
 0x189   : > { %v6068_v47 = vpop.f32.mrb[68].mxu0 }
 0x18a   : > { %6954 = vst [vmem:[#allocation49_spill] sm:$0xff] %v6068_v47  ;;  %v6070_v41 = vpop.f32.mrb[69].mxu0 }
 0x18b   : > { %6955 = vst [vmem:[#allocation50_spill] sm:$0xff] %v6070_v41  ;;  %3851 = vmatmul.mubr.msk.bf16.vlgmr.msra.gmra.mrb[68].mxu1 %vm459_vm3, %v4523_v15  ;;  %v6073_v48 = vpop.f32.mrb[70].mxu0 }
 0x18c   : > { %6956 = vst [vmem:[#allocation51_spill] sm:$0xff] %v6073_v48  ;;  %v6075_v59 = vpop.f32.mrb[71].mxu0 }
 0x18d   : > { %6957 = vst [vmem:[#allocation52_spill] sm:$0xff] %v6075_v59 }
 0x191   : > { %v6077_v21 = vpop.f32.mrb[72].mxu0 }
 0x192   : > { %6958 = vst [vmem:[#allocation53_spill] sm:$0xff] %v6077_v21  ;;  %v6079_v6 = vpop.f32.mrb[73].mxu0 }
 0x193   : > { %6959 = vst [vmem:[#allocation54_spill] sm:$0xff] %v6079_v6  ;;  %v6081_v46 = vpop.f32.mrb[74].mxu0 }
 0x194   : > { %6960 = vst [vmem:[#allocation55_spill] sm:$0xff] %v6081_v46  ;;  %v6083_v14 = vpop.f32.mrb[75].mxu0 }
 0x195   : > { %6961 = vst [vmem:[#allocation56_spill] sm:$0xff] %v6083_v14 }
 0x199   : > { %v6086_v62 = vpop.f32.mrb[76].mxu0 }
 0x19a   : > { %6962 = vst [vmem:[#allocation57_spill] sm:$0xff] %v6086_v62  ;;  %v6088_v47 = vpop.f32.mrb[77].mxu0 }
 0x19b   : > { %6963 = vst [vmem:[#allocation58_spill] sm:$0xff] %v6088_v47  ;;  %v6090_v41 = vpop.f32.mrb[78].mxu0 }
 0x19c   : > { %6964 = vst [vmem:[#allocation59_spill] sm:$0xff] %v6090_v41  ;;  %v6092_v15 = vpop.f32.mrb[79].mxu0 }
 0x19d   : > { %6965 = vst [vmem:[#allocation60_spill] sm:$0xff] %v6092_v15 }
 0x1a1   : > { %v6094_v48 = vpop.f32.mrb[80].mxu0 }
 0x1a2   : > { %6966 = vst [vmem:[#allocation61_spill] sm:$0xff] %v6094_v48  ;;  %v6096_v59 = vpop.f32.mrb[81].mxu0 }
 0x1a3   : > { %6967 = vst [vmem:[#allocation62_spill] sm:$0xff] %v6096_v59  ;;  %v6098_v21 = vpop.f32.mrb[82].mxu0 }
 0x1a4   : > { %6968 = vst [vmem:[#allocation63_spill] sm:$0xff] %v6098_v21  ;;  %v6100_v6 = vpop.f32.mrb[83].mxu0 }
 0x1a5   : > { %6969 = vst [vmem:[#allocation64_spill] sm:$0xff] %v6100_v6 }
 0x1a9   : > { %v6102_v46 = vpop.f32.mrb[84].mxu0 }
 0x1aa   : > { %6970 = vst [vmem:[#allocation65_spill] sm:$0xff] %v6102_v46  ;;  %v6104_v14 = vpop.f32.mrb[85].mxu0 }
 0x1ab   : > { %6971 = vst [vmem:[#allocation66_spill] sm:$0xff] %v6104_v14  ;;  %v6106_v42 = vpop.f32.mrb[86].mxu0 }
 0x1ac   : > { %6972 = vst [vmem:[#allocation67_spill] sm:$0xff] %v6106_v42  ;;  %v6108_v62 = vpop.f32.mrb[87].mxu0 }
 0x1ad   : > { %6973 = vst [vmem:[#allocation68_spill] sm:$0xff] %v6108_v62 }
 0x1b1   : > { %v6110_v47 = vpop.f32.mrb[88].mxu0 }
 0x1b2   : > { %v6112_v41 = vpop.f32.mrb[89].mxu0 }
 0x1b3   : > { %v6114_v15 = vpop.f32.mrb[90].mxu0 }
 0x1b4   : > { %v6116_v48 = vpop.f32.mrb[91].mxu0 }
 0x1b9   : > { %v6118_v59 = vpop.f32.mrb[92].mxu0 }
 0x1ba   : > { %v6120_v21 = vpop.f32.mrb[93].mxu0 }
 0x1bb   : > { %v6122_v6 = vpop.f32.mrb[94].mxu0 }
 0x1bc   : > { %v6124_v46 = vpop.f32.mrb[95].mxu0 }
 0x1c1   : > { %v6126_v14 = vpop.f32.mrb[96].mxu0 }
 0x1c2   : > { %6974 = vst [vmem:[#allocation69_spill] sm:$0xff] %v6126_v14  ;;  %v6128_v42 = vpop.f32.mrb[97].mxu0 }
 0x1c3   : > { %6975 = vst [vmem:[#allocation70_spill] sm:$0xff] %v6128_v42  ;;  %v6130_v62 = vpop.f32.mrb[98].mxu0  ;;  %v2427_v42 = vsel %vm2051_vm4, %v5740_v61, %v5875_v29  ;;  %v2428_v61 = vsel %vm2051_vm4, %v5744_v3, %v5881_v31  ;;  %v2431_v29 = vsel %vm2051_vm4, %v5769_v10, %v5878_v34  ;;  %v6984_v34 = vld [vmem:[#allocation34_spill] sm:$0xff] }
 0x1c4   : > { %v6132_v24 = vpop.f32.mrb[99].mxu0  ;;  %vm2497_vm10 = vcmp.lt.f32.partialorder %v6984_v34, 8.0 }
 0x1c9   : > { %v6134_v39 = vpop.f32.mrb[100].mxu0 }
 0x1ca   : > { %6976 = vst [vmem:[#allocation71_spill] sm:$0xff] %v6134_v39  ;;  %v6136_v49 = vpop.f32.mrb[101].mxu0 }
 0x1cb   : > { %6977 = vst [vmem:[#allocation72_spill] sm:$0xff] %v6136_v49  ;;  %v6138_v37 = vpop.f32.mrb[102].mxu0  ;;  %v2426_v49 = vsel %vm2051_vm4, %v5737_v18, %v5861_v26 }
 0x1cc   : > { %v6140_v25 = vpop.f32.mrb[103].mxu0 }
 0x1cd   : > { %6978 = vst [vmem:[#allocation73_spill] sm:$0xff] %v6140_v25  ;;  %v2449_v25 = vmul.f32 %v2427_v42, %v5760_v55 }
 0x1d1   : > { %v6142_v40 = vpop.f32.mrb[104].mxu0 }
 0x1d2   : > { %6979 = vst [vmem:[#allocation74_spill] sm:$0xff] %v6142_v40  ;;  %v6144_v36 = vpop.f32.mrb[105].mxu0  ;;  %v2448_v40 = vmul.f32 %v2426_v49, %v5751_v60  ;;  %v2450_v49 = vmul.f32 %v2428_v61, %v5778_v19 }
 0x1d3   : > { %6980 = vst [vmem:[#allocation75_spill] sm:$0xff] %v6144_v36  ;;  %v6146_v17 = vpop.f32.mrb[106].mxu0  ;;  %v2429_v36 = vsel %vm2051_vm4, %v5754_v52, %v5869_v45 }
 0x1d4   : > { %6981 = vst [vmem:[#allocation76_spill] sm:$0xff] %v6146_v17  ;;  %v6148_v14 = vpop.f32.mrb[107].mxu0  ;;  %v2451_v3 = vmul.f32 %v2429_v36, %v5793_v44 }
 0x1d5   : > { %6982 = vst [vmem:[#allocation77_spill] sm:$0xff] %v6148_v14 }
 0x1d9   : > { %v6159_v39 = vpop.f32.mrb[108].mxu0 }
 0x1da   : > { %v4266_v14 = vpop.f32.mrb[0].mxu1  ;;  %v6166_v17 = vpop.f32.mrb[109].mxu0 }
 0x1db   : > { %v6172_v18 = vsub.f32 %v4266_v14, %v2449_v25  ;;  %v1919_v55 = vpop.f32.mrb[1].mxu1  ;;  %v6174_v26 = vpop.f32.mrb[110].mxu0  ;;  %v6983_v14 = vld [vmem:[#allocation6_spill] sm:$0xff] }
 0x1dc   : > { %v6178_v52 = vsub.f32 %v1919_v55, %v2448_v40  ;;  %v6180_v45 = vpop.f32.mrb[111].mxu0  ;;  %v2430_v44 = vsel %vm2051_vm4, %v6983_v14, %v5890_v38  ;;  %v2453_v55 = vmul.f32 %v2431_v29, %v5824_v12  ;;  %v2455_v38 = vmul.f32 %v2433_v28, %v5843_v11  ;;  %v6987_v29 = vld [vmem:[#allocation7_spill] sm:$0xff]  ;;  %v6988_v11 = vld [vmem:[#allocation9_spill] sm:$0xff] }
 0x1dd   : > { %v2515_v60 = vsub.f32 0.0, %v6172_v18  ;;  %vm2498_vm12 = vcmp.lt.f32.partialorder %v6987_v29, 8.0  ;;  %v2435_v28 = vsel %vm2051_vm4, %v6988_v11, %v5893_v58 }
 0x1de   : > { %v2514_v31 = vsub.f32 0.0, %v6178_v52  ;;  %v4269_v40 = vpop.f32.mrb[2].mxu1 }
 0x1df   : > { %v2537_v42 = vsel %vm2493_vm5, %v2515_v60, -3e+38  ;;  %v6201_v25 = vsub.f32 %v4269_v40, %v2451_v3  ;;  %v1931_v10 = vpop.f32.mrb[3].mxu1  ;;  %v6985_v3 = vld [vmem:[#allocation10_spill] sm:$0xff]  ;;  %v6986_v40 = vld [vmem:[#allocation5_spill] sm:$0xff] }
 0x1e0   : > { %v2965_v32 = vmax.f32 %v2537_v42, %v5999_v33  ;;  %v2536_v43 = vsel %vm2492_vm6, %v2514_v31, -3e+38  ;;  %v6207_v36 = vsub.f32 %v1931_v10, %v2450_v49  ;;  %vm2499_vm11 = vcmp.lt.f32.partialorder %v6985_v3, 8.0 }
 0x1e1   : > { %v2964_v19 = vmax.f32 %v2536_v43, %v5993_v8  ;;  %v2517_v61 = vsub.f32 0.0, %v6201_v25  ;;  %v6213_v60 = vpop.f32.mrb[112].mxu0  ;;  %v2432_v27 = vsel %vm2051_vm4, %v6986_v40, %v5898_v16  ;;  %v2452_v8 = vmul.f32 %v2430_v44, %v5809_v7 }
 0x1e2   : > { %v2516_v33 = vsub.f32 0.0, %v6207_v36  ;;  %v4272_v31 = vpop.f32.mrb[4].mxu1  ;;  %v6222_v49 = vpop.f32.mrb[113].mxu0  ;;  %v2987_v12 = vmax.f32 %v2965_v32, %v6002_v2 }
 0x1e3   : > { %v2539_v14 = vsel %vm2495_vm8, %v2517_v61, -3e+38  ;;  %v6232_v16 = vsub.f32 %v4272_v31, %v2453_v55  ;;  %v1943_v42 = vpop.f32.mrb[5].mxu1  ;;  %v6234_v10 = vpop.f32.mrb[114].mxu0  ;;  %v2986_v7 = vmax.f32 %v2964_v19, %v5995_v35  ;;  %v2454_v55 = vmul.f32 %v2432_v27, %v5834_v30  ;;  %v6989_v35 = vld [vmem:[#allocation18_spill] sm:$0xff] }
 0x1e4   : > { %v2967_v44 = vmax.f32 %v2539_v14, %v6012_v51  ;;  %v2538_v2 = vsel %vm2494_vm7, %v2516_v33, -3e+38  ;;  %v6240_v32 = vsub.f32 %v1943_v42, %v2452_v8  ;;  %v6242_v43 = vpop.f32.mrb[115].mxu0  ;;  %v3009_v58 = vmax.f32 %v2987_v12, %v6114_v15 }
 0x1e5   : > { %v2966_v54 = vmax.f32 %v2538_v2, %v6006_v50  ;;  %v2519_v61 = vsub.f32 0.0, %v6232_v16  ;;  %v3008_v40 = vmax.f32 %v2986_v7, %v6110_v47  ;;  %v2434_v57 = vsel %vm2051_vm4, %v6989_v35, %v5909_v5  ;;  %v6990_v2 = vld [vmem:[#allocation8_spill] sm:$0xff]  ;;  %v6994_v35 = vld [vmem:[#allocation37_spill] sm:$0xff] }
 0x1e6   : > { %v2518_v51 = vsub.f32 0.0, %v6240_v32  ;;  %v4275_v19 = vpop.f32.mrb[6].mxu1  ;;  %v6255_v33 = vmax.f32 %v3009_v58, %v6116_v48  ;;  %v2989_v15 = vmax.f32 %v2967_v44, %v6015_v4  ;;  %v2457_v8 = vmul.f32 %v2435_v28, %v5863_v13  ;;  %v6991_v58 = vld [vmem:[#allocation36_spill] sm:$0xff] }
 0x1e7   : > { %v2541_v50 = vsel %vm2497_vm10, %v2519_v61, -3e+38  ;;  %v6260_v31 = vsub.f32 %v4275_v19, %v2455_v38  ;;  %v1955_v30 = vpop.f32.mrb[7].mxu1  ;;  %v6263_v47 = vmax.f32 %v3008_v40, %v6112_v41  ;;  %v2988_v63 = vmax.f32 %v2966_v54, %v6008_v22  ;;  %v6992_v61 = vld [vmem:[#allocation69_spill] sm:$0xff] }
 0x1e8   : > { %v2969_v5 = vmax.f32 %v2541_v50, %v6025_v56  ;;  %v2540_v27 = vsel %vm2496_vm9, %v2518_v51, -3e+38  ;;  %v6269_v48 = vsub.f32 %v1955_v30, %v2454_v55  ;;  %v3011_v4 = vmax.f32 %v2989_v15, %v6122_v6  ;;  %v6996_v50 = vld [vmem:[#allocation70_spill] sm:$0xff] }
 0x1e9   : > { %v2968_v34 = vmax.f32 %v2540_v27, %v6019_v23  ;;  %v2521_v38 = vsub.f32 0.0, %v6260_v31  ;;  %v6275_v12 = vpop.f32.mrb[116].mxu0  ;;  %v3010_v41 = vmax.f32 %v2988_v63, %v6118_v59  ;;  %v2456_v53 = vmul.f32 %v2434_v57, %v5859_v0  ;;  %v6997_v63 = vld [vmem:[#allocation45_spill] sm:$0xff]  ;;  %v6998_v27 = vld [vmem:[#allocation42_spill] sm:$0xff] }
 0x1ea   : > { %v2520_v22 = vsub.f32 0.0, %v6269_v48  ;;  %v4278_v56 = vpop.f32.mrb[8].mxu1  ;;  %v6280_v11 = vpop.f32.mrb[117].mxu0  ;;  %v6283_v14 = vmax.f32 %v3011_v4, %v6124_v46  ;;  %v2991_v23 = vmax.f32 %v2969_v5, %v6028_v20  ;;  %vm2500_vm13 = vcmp.lt.f32.partialorder %v6990_v2, 8.0  ;;  %v7004_v2 = vld [vmem:[#allocation73_spill] sm:$0xff] }
 0x1eb   : > { %v2543_v6 = vsel %vm2499_vm11, %v2521_v38, -3e+38  ;;  %v6288_v13 = vsub.f32 %v4278_v56, %v2457_v8  ;;  %v1967_v28 = vpop.f32.mrb[9].mxu1  ;;  %v6290_v42 = vpop.f32.mrb[118].mxu0  ;;  %v6293_v59 = vmax.f32 %v3010_v41, %v6120_v21  ;;  %v2990_v0 = vmax.f32 %v2968_v34, %v6021_v1  ;;  %v6993_v1 = vld [vmem:[#allocation11_spill] sm:$0xff]  ;;  %v6999_v38 = vld [vmem:[#allocation13_spill] sm:$0xff] }
 0x1ec   : > { %v2971_v7 = vmax.f32 %v2543_v6, %v6038_v9  ;;  %v2542_v46 = vsel %vm2498_vm12, %v2520_v22, -3e+38  ;;  %v6299_v44 = vsub.f32 %v1967_v28, %v2456_v53  ;;  %v6301_v20 = vpop.f32.mrb[119].mxu0  ;;  %v3013_v3 = vmax.f32 %v2991_v23, %v6130_v62  ;;  %v6995_v62 = vld [vmem:[#allocation12_spill] sm:$0xff]  ;;  %v7000_v41 = vld [vmem:[#allocation15_spill] sm:$0xff] }
 0x1ed   : > { %v2970_v54 = vmax.f32 %v2542_v46, %v6991_v58  ;;  %v2523_v21 = vsub.f32 0.0, %v6288_v13  ;;  %v3012_v55 = vmax.f32 %v2990_v0, %v6992_v61  ;;  %vm2501_vm14 = vcmp.lt.f32.partialorder %v6993_v1, 8.0  ;;  %v7001_v22 = vld [vmem:[#allocation39_spill] sm:$0xff]  ;;  %v7003_v0 = vld [vmem:[#allocation16_spill] sm:$0xff] }
 0x1ee   : > { %v2522_v9 = vsub.f32 0.0, %v6299_v44  ;;  %v4281_v29 = vpop.f32.mrb[10].mxu1  ;;  %v6311_v40 = vmax.f32 %v3013_v3, %v6132_v24  ;;  %v2993_v57 = vmax.f32 %v2971_v7, %v6994_v35  ;;  %vm2502_vm15 = vcmp.lt.f32.partialorder %v7000_v41, 8.0  ;;  %v7002_v6 = vld [vmem:[#allocation71_spill] sm:$0xff]  ;;  %v7006_v61 = vld [vmem:[#allocation48_spill] sm:$0xff] }
 0x1ef   : > { %v2545_v51 = vsel %vm2501_vm14, %v2523_v21, -3e+38  ;;  %v6315_v19 = vsub.f32 %v4281_v29, %v6995_v62  ;;  %v1979_v15 = vpop.f32.mrb[11].mxu1  ;;  %v6318_v30 = vmax.f32 %v3012_v55, %v6996_v50  ;;  %v2992_v5 = vmax.f32 %v2970_v54, %v6997_v63  ;;  %v7007_v29 = vld [vmem:[#allocation72_spill] sm:$0xff]  ;;  %v7009_v62 = vld [vmem:[#allocation46_spill] sm:$0xff] }
 0x1f0   : > { %v2973_v4 = vmax.f32 %v2545_v51, %v6998_v27  ;;  %v2544_v34 = vsel %vm2500_vm13, %v2522_v9, -3e+38  ;;  %v6323_v8 = vsub.f32 %v1979_v15, %v6999_v38  ;;  %v3015_v24 = vmax.f32 %v2993_v57, %v6138_v37  ;;  %v7005_v37 = vld [vmem:[#allocation47_spill] sm:$0xff]  ;;  %v7008_v57 = vld [vmem:[#allocation41_spill] sm:$0xff]  ;;  %v7010_v63 = vld [vmem:[#allocation24_spill] sm:$0xff] }
 0x1f1   : > { %v2972_v56 = vmax.f32 %v2544_v34, %v7001_v22  ;;  %v2525_v53 = vsub.f32 0.0, %v6315_v19  ;;  %v6329_v23 = vpop.f32.mrb[120].mxu0  ;;  %v3014_v28 = vmax.f32 %v2992_v5, %v7002_v6  ;;  %vm2503_vm0 = vcmp.lt.f32.partialorder %v7003_v0, 8.0  ;;  %v7012_v38 = vld [vmem:[#allocation19_spill] sm:$0xff]  ;;  %v7014_v6 = vld [vmem:[#allocation74_spill] sm:$0xff] }
 0x1f2   : > { %v2524_v7 = vsub.f32 0.0, %v6323_v8  ;;  %v4284_v46 = vpop.f32.mrb[12].mxu1  ;;  %v6334_v3 = vpop.f32.mrb[121].mxu0  ;;  %v6337_v58 = vmax.f32 %v3015_v24, %v7004_v2  ;;  %v2995_v54 = vmax.f32 %v2973_v4, %v7005_v37  ;;  %v7011_v4 = vld [vmem:[#allocation76_spill] sm:$0xff]  ;;  %vm2504_vm1 = vcmp.lt.f32.partialorder %v7012_v38, 8.0  ;;  %v7013_v24 = vld [vmem:[#allocation43_spill] sm:$0xff] }
 0x1f3   : > { %v2547_v21 = vsel %vm2503_vm0, %v2525_v53, -3e+38  ;;  %v6341_v55 = vsub.f32 %v4284_v46, %v7006_v61  ;;  %v1991_v1 = vpop.f32.mrb[13].mxu1  ;;  %v6343_v9 = vpop.f32.mrb[122].mxu0  ;;  %v6346_v35 = vmax.f32 %v3014_v28, %v7007_v29  ;;  %v2994_v51 = vmax.f32 %v2972_v56, %v7008_v57  ;;  %v7015_v28 = vld [vmem:[#allocation20_spill] sm:$0xff]  ;;  %v7019_v29 = vld [vmem:[#allocation75_spill] sm:$0xff] }
 0x1f4   : > { %v2975_v15 = vmax.f32 %v2547_v21, %v7009_v62  ;;  %v2546_v50 = vsel %vm2502_vm15, %v2524_v7, -3e+38  ;;  %v6353_v5 = vsub.f32 %v1991_v1, %v7010_v63  ;;  %v6355_v27 = vpop.f32.mrb[123].mxu0  ;;  %v3017_v34 = vmax.f32 %v2995_v54, %v7011_v4  ;;  %v7016_v7 = vld [vmem:[#allocation77_spill] sm:$0xff]  ;;  %v7017_v2 = vld [vmem:[#allocation32_spill] sm:$0xff]  ;;  %v7018_v54 = vld [vmem:[#allocation14_spill] sm:$0xff] }
 0x1f5   : > { %v2974_v22 = vmax.f32 %v2546_v50, %v7013_v24  ;;  %v2527_v53 = vsub.f32 0.0, %v6341_v55  ;;  %v3016_v56 = vmax.f32 %v2994_v51, %v7014_v6  ;;  %vm2505_vm2 = vcmp.lt.f32.partialorder %v7015_v28, 8.0  ;;  %v7020_v62 = vld [vmem:[#allocation44_spill] sm:$0xff]  ;;  %v7021_v50 = vld [vmem:[#allocation51_spill] sm:$0xff]  ;;  %v7022_v38 = vld [vmem:[#allocation21_spill] sm:$0xff] }
 0x1f6   : > { %v2526_v41 = vsub.f32 0.0, %v6353_v5  ;;  %v4287_v0 = vpop.f32.mrb[14].mxu1  ;;  %v6365_v46 = vmax.f32 %v3017_v34, %v7016_v7  ;;  %v2997_v37 = vmax.f32 %v2975_v15, %v7017_v2  ;;  %v7023_v6 = vld [vmem:[#allocation23_spill] sm:$0xff]  ;;  %v7024_v15 = vld [vmem:[#allocation49_spill] sm:$0xff] }
 0x1f7   : > { %v2549_v21 = vsel %vm2505_vm2, %v2527_v53, -3e+38  ;;  %v6369_v61 = vsub.f32 %v4287_v0, %v7018_v54  ;;  %v2003_v1 = vpop.f32.mrb[15].mxu1  ;;  %v6372_v57 = vmax.f32 %v3016_v56, %v7019_v29  ;;  %v2996_v51 = vmax.f32 %v2974_v22, %v7020_v62  ;;  %v7025_v7 = vld [vmem:[#allocation25_spill] sm:$0xff] }
 0x1f8   : > { %v2977_v63 = vmax.f32 %v2549_v21, %v7021_v50  ;;  %v2548_v4 = vsel %vm2504_vm1, %v2526_v41, -3e+38  ;;  %v6377_v24 = vsub.f32 %v2003_v1, %v7022_v38  ;;  %v3019_v34 = vmax.f32 %v2997_v37, %v6174_v26  ;;  %v7026_v26 = vld [vmem:[#allocation52_spill] sm:$0xff]  ;;  %v7027_v1 = vld [vmem:[#allocation17_spill] sm:$0xff]  ;;  %v7030_v38 = vld [vmem:[#allocation55_spill] sm:$0xff] }
 0x1f9   : > { %vm2506_vm3 = vcmp.lt.f32.partialorder %v7023_v6, 8.0  ;;  %v2976_v53 = vmax.f32 %v2548_v4, %v7024_v15  ;;  %v2529_v28 = vsub.f32 0.0, %v6369_v61  ;;  %v6383_v0 = vpop.f32.mrb[124].mxu0  ;;  %v3018_v56 = vmax.f32 %v2996_v51, %v6159_v39  ;;  %v7029_v51 = vld [vmem:[#allocation50_spill] sm:$0xff] }
 0x1fa   : > { %vm2507_vm4 = vcmp.lt.f32.partialorder %v7025_v7, 8.0  ;;  %v2528_v22 = vsub.f32 0.0, %v6377_v24  ;;  %v4290_v41 = vpop.f32.mrb[16].mxu1  ;;  %v6388_v2 = vpop.f32.mrb[125].mxu0  ;;  %v6391_v21 = vmax.f32 %v3019_v34, %v6180_v45  ;;  %v2999_v37 = vmax.f32 %v2977_v63, %v7026_v26  ;;  %v7031_v34 = vld [vmem:[#allocation22_spill] sm:$0xff]  ;;  %v7034_v26 = vld [vmem:[#allocation53_spill] sm:$0xff] }
 0x1fb   : > { %v2551_v54 = vsel %vm2507_vm4, %v2529_v28, -3e+38  ;;  %v6395_v29 = vsub.f32 %v4290_v41, %v7027_v1  ;;  %v2015_v62 = vpop.f32.mrb[17].mxu1  ;;  %v6397_v50 = vpop.f32.mrb[126].mxu0  ;;  %v6400_v39 = vmax.f32 %v3018_v56, %v6166_v17  ;;  %v2998_v4 = vmax.f32 %v2976_v53, %v7029_v51  ;;  %v7033_v41 = vld [vmem:[#allocation28_spill] sm:$0xff] }
 0x1fc   : > { %v2979_v15 = vmax.f32 %v2551_v54, %v7030_v38  ;;  %v2550_v45 = vsel %vm2506_vm3, %v2528_v22, -3e+38  ;;  %v6407_v7 = vsub.f32 %v2015_v62, %v7031_v34  ;;  %v6409_v63 = vpop.f32.mrb[127].mxu0  ;;  %v3021_v28 = vmax.f32 %v2999_v37, %v6234_v10  ;;  %v7035_v56 = vld [vmem:[#allocation40_spill] sm:$0xff]  ;;  %v7037_v10 = vld [vmem:[#allocation26_spill] sm:$0xff] }
 0x1fd   : > { %7028 = vst [vmem:[#allocation6_spill] sm:$0xff] %v6395_v29  ;;  %vm2508_vm5 = vcmp.lt.f32.partialorder %v7033_v41, 8.0  ;;  %v2978_v1 = vmax.f32 %v2550_v45, %v7034_v26  ;;  %v2531_v17 = vsub.f32 0.0, %v6395_v29  ;;  %v3020_v53 = vmax.f32 %v2998_v4, %v6213_v60  ;;  %v7036_v54 = vld [vmem:[#allocation56_spill] sm:$0xff]  ;;  %v7039_v41 = vld [vmem:[#allocation54_spill] sm:$0xff] }
 0x1fe   : > { %7032 = vst [vmem:[#allocation34_spill] sm:$0xff] %v6407_v7  ;;  %vm2509_vm6 = vcmp.lt.f32.partialorder %v7035_v56, 8.0  ;;  %v3001_v6 = vmax.f32 %v2979_v15, %v7036_v54  ;;  %v2530_v22 = vsub.f32 0.0, %v6407_v7  ;;  %v4293_v62 = vpop.f32.mrb[18].mxu1  ;;  %v6420_v51 = vmax.f32 %v3021_v28, %v6242_v43  ;;  %v7040_v15 = vld [vmem:[#allocation59_spill] sm:$0xff]  ;;  %v7042_v43 = vld [vmem:[#allocation29_spill] sm:$0xff] }
 0x1ff   : > { %v2553_v38 = vsel %vm2509_vm6, %v2531_v17, -3e+38  ;;  %v6423_v37 = vsub.f32 %v4293_v62, %v7037_v10  ;;  %v2027_v34 = vpop.f32.mrb[19].mxu1  ;;  %v6426_v45 = vmax.f32 %v3020_v53, %v6222_v49  ;;  %v3000_v60 = vmax.f32 %v2978_v1, %v7039_v41  ;;  %v7041_v54 = vld [vmem:[#allocation27_spill] sm:$0xff]  ;;  %v7043_v28 = vld [vmem:[#allocation57_spill] sm:$0xff]  ;;  %v7046_v41 = vld [vmem:[#allocation58_spill] sm:$0xff] }
 0x200   : > { %v3023_v4 = vmax.f32 %v3001_v6, %v6290_v42  ;;  %v2552_v26 = vsel %vm2508_vm5, %v2530_v22, -3e+38  ;;  %v2981_v56 = vmax.f32 %v2553_v38, %v7040_v15  ;;  %v6432_v29 = vsub.f32 %v2027_v34, %v7041_v54  ;;  %v7044_v53 = vld [vmem:[#allocation33_spill] sm:$0xff]  ;;  %v7045_v42 = vld [vmem:[#allocation60_spill] sm:$0xff] }
 0x201   : > { %7038 = vst [vmem:[#allocation10_spill] sm:$0xff] %v6423_v37  ;;  %vm2510_vm7 = vcmp.lt.f32.partialorder %v7042_v43, 8.0  ;;  %v2980_v17 = vmax.f32 %v2552_v26, %v7043_v28  ;;  %v2533_v62 = vsub.f32 0.0, %v6423_v37  ;;  %v2955_v10 = vpop.f32.mrb[128].mxu0  ;;  %v3022_v49 = vmax.f32 %v3000_v60, %v6275_v12  ;;  %v7047_v26 = vld [vmem:[#allocation31_spill] sm:$0xff] }
 0x202   : > { %vm2511_vm8 = vcmp.lt.f32.partialorder %v7044_v53, 8.0  ;;  %v6440_v1 = vmax.f32 %v3023_v4, %v6301_v20  ;;  %v3003_v6 = vmax.f32 %v2981_v56, %v7045_v42  ;;  %v2532_v22 = vsub.f32 0.0, %v6432_v29  ;;  %v4296_v38 = vpop.f32.mrb[20].mxu1  ;;  %v2957_v34 = vpop.f32.mrb[129].mxu0  ;;  %v7049_v4 = vld [vmem:[#allocation30_spill] sm:$0xff]  ;;  %v7051_v53 = vld [vmem:[#allocation63_spill] sm:$0xff] }
 0x203   : > { %v3002_v15 = vmax.f32 %v2980_v17, %v7046_v41  ;;  %v2555_v54 = vsel %vm2511_vm8, %v2533_v62, -3e+38  ;;  %v6446_v28 = vsub.f32 %v4296_v38, %v7047_v26  ;;  %v2039_v37 = vpop.f32.mrb[21].mxu1  ;;  %v2959_v7 = vpop.f32.mrb[130].mxu0  ;;  %v6449_v12 = vmax.f32 %v3022_v49, %v6280_v11  ;;  %v7052_v62 = vld [vmem:[#allocation35_spill] sm:$0xff]  ;;  %v7053_v26 = vld [vmem:[#allocation61_spill] sm:$0xff] }
 0x204   : > { %v3025_v20 = vmax.f32 %v3003_v6, %v6343_v9  ;;  %v2554_v60 = vsel %vm2510_vm7, %v2532_v22, -3e+38  ;;  %v6455_v56 = vsub.f32 %v2039_v37, %v7049_v4  ;;  %v2983_v42 = vmax.f32 %v2555_v54, %v7051_v53  ;;  %v2961_v17 = vpop.f32.mrb[131].mxu0  ;;  %v7054_v49 = vld [vmem:[#allocation38_spill] sm:$0xff]  ;;  %v7055_v37 = vld [vmem:[#allocation64_spill] sm:$0xff] }
 0x205   : > { %7048 = vst [vmem:[#allocation5_spill] sm:$0xff] %v6446_v28  ;;  %vm2512_vm9 = vcmp.lt.f32.partialorder %v7052_v62, 8.0  ;;  %v3024_v38 = vmax.f32 %v3002_v15, %v6329_v23  ;;  %v2535_v41 = vsub.f32 0.0, %v6446_v28  ;;  %v2982_v11 = vmax.f32 %v2554_v60, %v7053_v26  ;;  %v7056_v53 = vld [vmem:[#allocation62_spill] sm:$0xff] }
 0x206   : > { %7050 = vst [vmem:[#allocation7_spill] sm:$0xff] %v6455_v56  ;;  %vm2513_vm10 = vcmp.lt.f32.partialorder %v7054_v49, 8.0  ;;  %v6464_v9 = vmax.f32 %v3025_v20, %v6355_v27  ;;  %v2534_v43 = vsub.f32 0.0, %v6455_v56  ;;  %v3005_v6 = vmax.f32 %v2983_v42, %v7055_v37  ;;  %v3206_v22 = vpop.f32.mrb[24].mxu1  ;;  %v7057_v49 = vld [vmem:[#allocation67_spill] sm:$0xff]  ;;  %v7058_v56 = vld [vmem:[#allocation65_spill] sm:$0xff] }
 0x207   : > { %v6469_v54 = vmax.f32 %v3024_v38, %v6334_v3  ;;  %v2557_v4 = vsel %vm2513_vm10, %v2535_v41, -3e+38  ;;  %v3004_v23 = vmax.f32 %v2982_v11, %v7056_v53  ;;  %v3458_v15 = vmax.f32 %v6263_v47, %v3206_v22  ;;  %v3208_v62 = vpop.f32.mrb[25].mxu1  ;;  %v7059_v47 = vld [vmem:[#allocation68_spill] sm:$0xff] }
 0x208   : > { %v2556_v60 = vsel %vm2512_vm9, %v2534_v43, -3e+38  ;;  %v3027_v26 = vmax.f32 %v3005_v6, %v6397_v50  ;;  %v2985_v27 = vmax.f32 %v2557_v4, %v7057_v49  ;;  %v3210_v20 = vpop.f32.mrb[26].mxu1  ;;  %v7060_v6 = vld [vmem:[#allocation66_spill] sm:$0xff] }
 0x209   : > { %v3026_v28 = vmax.f32 %v3004_v23, %v6383_v0  ;;  %v2984_v42 = vmax.f32 %v2556_v60, %v7058_v56  ;;  %v3480_v37 = vmax.f32 %v3458_v15, %v3208_v62  ;;  %v3459_v3 = vmax.f32 %v6255_v33, %v3210_v20  ;;  %v3212_v38 = vpop.f32.mrb[27].mxu1  ;;  %v3349_v41 = vpop.f32.mrb[132].mxu0 }
 0x20a   : > { %v6479_v11 = vmax.f32 %v3027_v26, %v6409_v63  ;;  %v3007_v43 = vmax.f32 %v2985_v27, %v7059_v47  ;;  %v3351_v22 = vpop.f32.mrb[133].mxu0  ;;  %v6493_v63 = vld [vmem:[%s6653_s5] ss:$0 sm:$0xff] }
 0x20b   : > { %v6483_v50 = vmax.f32 %v3026_v28, %v6388_v2  ;;  %v3006_v4 = vmax.f32 %v2984_v42, %v7060_v6  ;;  %v3481_v0 = vmax.f32 %v3459_v3, %v3212_v38  ;;  %v3502_v53 = vmax.f32 %v3480_v37, %v3349_v41  ;;  %v3353_v56 = vpop.f32.mrb[134].mxu0 }
 0x20c   : > { %v3029_v23 = vmax.f32 %v3007_v43, %v2959_v7  ;;  %v3355_v15 = vpop.f32.mrb[135].mxu0 }
 0x20d   : > { %v3028_v33 = vmax.f32 %v3006_v4, %v2955_v10  ;;  %v3524_v62 = vmax.f32 %v3502_v53, %v3351_v22  ;;  %v3503_v60 = vmax.f32 %v3481_v0, %v3353_v56 }
 0x20e   : > { %v6486_v49 = vmax.f32 %v3029_v23, %v2961_v17  ;;  %v3216_v2 = vpop.f32.mrb[28].mxu1 }
 0x20f   : > { %v6495_v28 = vmax.f32 %v3028_v33, %v2957_v34  ;;  %v3546_v26 = vadd.f32 %v3524_v62, %v6178_v52  ;;  %v3460_v7 = vmax.f32 %v6293_v59, %v3216_v2  ;;  %v3525_v27 = vmax.f32 %v3503_v60, %v3355_v15  ;;  %v3218_v10 = vpop.f32.mrb[29].mxu1 }
 0x210   : > { %v3220_v20 = vpop.f32.mrb[30].mxu1 }
 0x211   : > { %v3575_v17 = vadd.f32 %v6493_v63, %v3546_v26  ;;  %v3547_v42 = vadd.f32 %v3525_v27, %v6172_v18  ;;  %v3482_v37 = vmax.f32 %v3460_v7, %v3218_v10  ;;  %v3461_v3 = vmax.f32 %v6283_v14, %v3220_v20  ;;  %v3222_v38 = vpop.f32.mrb[31].mxu1  ;;  %v3359_v41 = vpop.f32.mrb[136].mxu0 }
 0x212   : > { %v3361_v47 = vpop.f32.mrb[137].mxu0 }
 0x213   : > { %v3597_v43 = vmax.f32 %v3575_v17, 0.0  ;;  %v3576_v34 = vadd.f32 %v6493_v63, %v3547_v42  ;;  %v3483_v22 = vmax.f32 %v3461_v3, %v3222_v38  ;;  %v3504_v52 = vmax.f32 %v3482_v37, %v3359_v41  ;;  %v3363_v6 = vpop.f32.mrb[138].mxu0 }
 0x214   : > { %v3365_v59 = vpop.f32.mrb[139].mxu0 }
 0x215   : > { %3619 = vst [vmem:[%s6503_s29] sm:$0xff] %v3597_v43  ;;  %v3598_v4 = vmax.f32 %v3576_v34, 0.0  ;;  %v3526_v18 = vmax.f32 %v3504_v52, %v3361_v47  ;;  %v3505_v0 = vmax.f32 %v3483_v22, %v3363_v6 }
 0x216   : > { %v3226_v53 = vpop.f32.mrb[32].mxu1 }
 0x217   : > { %3620 = vst [vmem:[%s6503_s29 + $0x8] sm:$0xff] %v3598_v4  ;;  %v3548_v14 = vadd.f32 %v3526_v18, %v6207_v36  ;;  %v3462_v56 = vmax.f32 %v6318_v30, %v3226_v53  ;;  %v3527_v23 = vmax.f32 %v3505_v0, %v3365_v59  ;;  %v3228_v15 = vpop.f32.mrb[33].mxu1 }
 0x218   : > { %v3230_v33 = vpop.f32.mrb[34].mxu1 }
 0x219   : > { %v3577_v62 = vadd.f32 %v6493_v63, %v3548_v14  ;;  %v3549_v60 = vadd.f32 %v3527_v23, %v6201_v25  ;;  %v3484_v2 = vmax.f32 %v3462_v56, %v3228_v15  ;;  %v3463_v26 = vmax.f32 %v6311_v40, %v3230_v33  ;;  %v3232_v7 = vpop.f32.mrb[35].mxu1  ;;  %v3369_v27 = vpop.f32.mrb[140].mxu0 }
 0x21a   : > { %v3371_v10 = vpop.f32.mrb[141].mxu0 }
 0x21b   : > { %v3599_v20 = vmax.f32 %v3577_v62, 0.0  ;;  %v3578_v36 = vadd.f32 %v6493_v63, %v3549_v60  ;;  %v3485_v17 = vmax.f32 %v3463_v26, %v3232_v7  ;;  %v3506_v30 = vmax.f32 %v3484_v2, %v3369_v27  ;;  %v3373_v42 = vpop.f32.mrb[142].mxu0 }
 0x21c   : > { %v3375_v37 = vpop.f32.mrb[143].mxu0 }
 0x21d   : > { %3621 = vst [vmem:[%s6503_s29 + $0x10] sm:$0xff] %v3599_v20  ;;  %v3600_v3 = vmax.f32 %v3578_v36, 0.0  ;;  %v3528_v38 = vmax.f32 %v3506_v30, %v3371_v10  ;;  %v3507_v41 = vmax.f32 %v3485_v17, %v3373_v42 }
 0x21e   : > { %v3236_v47 = vpop.f32.mrb[36].mxu1 }
 0x21f   : > { %3622 = vst [vmem:[%s6503_s29 + $0x18] sm:$0xff] %v3600_v3  ;;  %v3550_v25 = vadd.f32 %v3528_v38, %v6240_v32  ;;  %v3464_v40 = vmax.f32 %v6346_v35, %v3236_v47  ;;  %v3529_v43 = vmax.f32 %v3507_v41, %v3375_v37  ;;  %v3238_v34 = vpop.f32.mrb[37].mxu1 }
 0x220   : > { %v3240_v22 = vpop.f32.mrb[38].mxu1 }
 0x221   : > { %v3579_v52 = vadd.f32 %v6493_v63, %v3550_v25  ;;  %v3551_v6 = vadd.f32 %v3529_v43, %v6232_v16  ;;  %v3486_v59 = vmax.f32 %v3464_v40, %v3238_v34  ;;  %v3465_v4 = vmax.f32 %v6337_v58, %v3240_v22  ;;  %v3242_v18 = vpop.f32.mrb[39].mxu1  ;;  %v3379_v0 = vpop.f32.mrb[144].mxu0 }
 0x222   : > { %v3381_v53 = vpop.f32.mrb[145].mxu0 }
 0x223   : > { %v3601_v14 = vmax.f32 %v3579_v52, 0.0  ;;  %v3580_v32 = vadd.f32 %v6493_v63, %v3551_v6  ;;  %v3487_v56 = vmax.f32 %v3465_v4, %v3242_v18  ;;  %v3508_v35 = vmax.f32 %v3486_v59, %v3379_v0  ;;  %v3383_v23 = vpop.f32.mrb[146].mxu0 }
 0x224   : > { %v3385_v15 = vpop.f32.mrb[147].mxu0 }
 0x225   : > { %3623 = vst [vmem:[%s6503_s29 + $0x20] sm:$0xff] %v3601_v14  ;;  %v3602_v33 = vmax.f32 %v3580_v32, 0.0  ;;  %v3530_v62 = vmax.f32 %v3508_v35, %v3381_v53  ;;  %v3509_v60 = vmax.f32 %v3487_v56, %v3383_v23 }
 0x226   : > { %v3246_v2 = vpop.f32.mrb[40].mxu1 }
 0x227   : > { %3624 = vst [vmem:[%s6503_s29 + $0x28] sm:$0xff] %v3602_v33  ;;  %v3552_v16 = vadd.f32 %v3530_v62, %v6269_v48  ;;  %v3466_v58 = vmax.f32 %v6372_v57, %v3246_v2  ;;  %v3531_v26 = vmax.f32 %v3509_v60, %v3385_v15  ;;  %v3248_v7 = vpop.f32.mrb[41].mxu1 }
 0x228   : > { %v3250_v27 = vpop.f32.mrb[42].mxu1 }
 0x229   : > { %v3581_v10 = vadd.f32 %v6493_v63, %v3552_v16  ;;  %v3553_v20 = vadd.f32 %v3531_v26, %v6260_v31  ;;  %v3488_v36 = vmax.f32 %v3466_v58, %v3248_v7  ;;  %v3467_v17 = vmax.f32 %v6365_v46, %v3250_v27  ;;  %v3252_v30 = vpop.f32.mrb[43].mxu1  ;;  %v3389_v42 = vpop.f32.mrb[148].mxu0 }
 0x22a   : > { %v3391_v37 = vpop.f32.mrb[149].mxu0 }
 0x22b   : > { %v3603_v3 = vmax.f32 %v3581_v10, 0.0  ;;  %v3582_v48 = vadd.f32 %v6493_v63, %v3553_v20  ;;  %v3489_v38 = vmax.f32 %v3467_v17, %v3252_v30  ;;  %v3510_v57 = vmax.f32 %v3488_v36, %v3389_v42  ;;  %v3393_v41 = vpop.f32.mrb[150].mxu0 }
 0x22c   : > { %v3395_v47 = vpop.f32.mrb[151].mxu0 }
 0x22d   : > { %3625 = vst [vmem:[%s6503_s29 + $0x30] sm:$0xff] %v3603_v3  ;;  %v3604_v25 = vmax.f32 %v3582_v48, 0.0  ;;  %v3532_v40 = vmax.f32 %v3510_v57, %v3391_v37  ;;  %v3511_v43 = vmax.f32 %v3489_v38, %v3393_v41 }
 0x22e   : > { %v3256_v34 = vpop.f32.mrb[44].mxu1 }
 0x22f   : > { %3626 = vst [vmem:[%s6503_s29 + $0x38] sm:$0xff] %v3604_v25  ;;  %v3554_v31 = vadd.f32 %v3532_v40, %v6299_v44  ;;  %v3468_v46 = vmax.f32 %v6400_v39, %v3256_v34  ;;  %v3533_v22 = vmax.f32 %v3511_v43, %v3395_v47  ;;  %v3258_v52 = vpop.f32.mrb[45].mxu1 }
 0x230   : > { %v3260_v6 = vpop.f32.mrb[46].mxu1 }
 0x231   : > { %v3583_v59 = vadd.f32 %v6493_v63, %v3554_v31  ;;  %v3555_v4 = vadd.f32 %v3533_v22, %v6288_v13  ;;  %v3490_v18 = vmax.f32 %v3468_v46, %v3258_v52  ;;  %v3469_v0 = vmax.f32 %v6391_v21, %v3260_v6  ;;  %v3262_v53 = vpop.f32.mrb[47].mxu1  ;;  %v3399_v14 = vpop.f32.mrb[152].mxu0 }
 0x232   : > { %v3401_v32 = vpop.f32.mrb[153].mxu0 }
 0x233   : > { %v3605_v56 = vmax.f32 %v3583_v59, 0.0  ;;  %v3584_v44 = vadd.f32 %v6493_v63, %v3555_v4  ;;  %v3491_v35 = vmax.f32 %v3469_v0, %v3262_v53  ;;  %v3512_v39 = vmax.f32 %v3490_v18, %v3399_v14  ;;  %v3403_v23 = vpop.f32.mrb[154].mxu0 }
 0x234   : > { %v3405_v15 = vpop.f32.mrb[155].mxu0 }
 0x235   : > { %3627 = vst [vmem:[%s6503_s29 + $0x40] sm:$0xff] %v3605_v56  ;;  %v3606_v33 = vmax.f32 %v3584_v44, 0.0  ;;  %v3534_v62 = vmax.f32 %v3512_v39, %v3401_v32  ;;  %v3513_v60 = vmax.f32 %v3491_v35, %v3403_v23 }
 0x236   : > { %v3266_v2 = vpop.f32.mrb[48].mxu1 }
 0x237   : > { %3628 = vst [vmem:[%s6503_s29 + $0x48] sm:$0xff] %v3606_v33  ;;  %v3556_v13 = vadd.f32 %v3534_v62, %v6323_v8  ;;  %v3470_v21 = vmax.f32 %v6426_v45, %v3266_v2  ;;  %v3535_v16 = vmax.f32 %v3513_v60, %v3405_v15  ;;  %v3268_v58 = vpop.f32.mrb[49].mxu1 }
 0x238   : > { %v3270_v26 = vpop.f32.mrb[50].mxu1 }
 0x239   : > { %v3585_v7 = vadd.f32 %v6493_v63, %v3556_v13  ;;  %v3557_v27 = vadd.f32 %v3535_v16, %v6315_v19  ;;  %v3492_v10 = vmax.f32 %v3470_v21, %v3268_v58  ;;  %v3471_v20 = vmax.f32 %v6420_v51, %v3270_v26  ;;  %v3272_v36 = vpop.f32.mrb[51].mxu1  ;;  %v3409_v17 = vpop.f32.mrb[156].mxu0 }
 0x23a   : > { %v3411_v30 = vpop.f32.mrb[157].mxu0 }
 0x23b   : > { %v3607_v42 = vmax.f32 %v3585_v7, 0.0  ;;  %v3586_v8 = vadd.f32 %v6493_v63, %v3557_v27  ;;  %v3493_v37 = vmax.f32 %v3471_v20, %v3272_v36  ;;  %v3514_v45 = vmax.f32 %v3492_v10, %v3409_v17  ;;  %v3413_v3 = vpop.f32.mrb[158].mxu0 }
 0x23c   : > { %v3415_v48 = vpop.f32.mrb[159].mxu0 }
 0x23d   : > { %3629 = vst [vmem:[%s6503_s29 + $0x50] sm:$0xff] %v3607_v42  ;;  %v3608_v38 = vmax.f32 %v3586_v8, 0.0  ;;  %v3536_v57 = vmax.f32 %v3514_v45, %v3411_v30  ;;  %v3515_v41 = vmax.f32 %v3493_v37, %v3413_v3  ;;  %v7062_v45 = vld [vmem:[#allocation6_spill] sm:$0xff] }
 0x23e   : > { %v3276_v47 = vpop.f32.mrb[52].mxu1 }
 0x23f   : > { %3630 = vst [vmem:[%s6503_s29 + $0x58] sm:$0xff] %v3608_v38  ;;  %v3558_v19 = vadd.f32 %v3536_v57, %v6353_v5  ;;  %v3472_v51 = vmax.f32 %v6449_v12, %v3276_v47  ;;  %v3537_v25 = vmax.f32 %v3515_v41, %v3415_v48  ;;  %v3278_v40 = vpop.f32.mrb[53].mxu1 }
 0x240   : > { %v3280_v43 = vpop.f32.mrb[54].mxu1 }
 0x241   : > { %v3587_v34 = vadd.f32 %v6493_v63, %v3558_v19  ;;  %v3559_v31 = vadd.f32 %v3537_v25, %v6341_v55  ;;  %v3494_v46 = vmax.f32 %v3472_v51, %v3278_v40  ;;  %v3473_v22 = vmax.f32 %v6440_v1, %v3280_v43  ;;  %v3282_v52 = vpop.f32.mrb[55].mxu1  ;;  %v3419_v6 = vpop.f32.mrb[160].mxu0 }
 0x242   : > { %v3421_v59 = vpop.f32.mrb[161].mxu0 }
 0x243   : > { %v3609_v4 = vmax.f32 %v3587_v34, 0.0  ;;  %v3588_v5 = vadd.f32 %v6493_v63, %v3559_v31  ;;  %v3495_v18 = vmax.f32 %v3473_v22, %v3282_v52  ;;  %v3516_v12 = vmax.f32 %v3494_v46, %v3419_v6  ;;  %v3423_v0 = vpop.f32.mrb[162].mxu0 }
 0x244   : > { %v3425_v53 = vpop.f32.mrb[163].mxu0 }
 0x245   : > { %3631 = vst [vmem:[%s6503_s29 + $0x60] sm:$0xff] %v3609_v4  ;;  %v3610_v14 = vmax.f32 %v3588_v5, 0.0  ;;  %v3538_v32 = vmax.f32 %v3516_v12, %v3421_v59  ;;  %v3517_v56 = vmax.f32 %v3495_v18, %v3423_v0  ;;  %v7063_v18 = vld [vmem:[#allocation10_spill] sm:$0xff] }
 0x246   : > { %v3286_v44 = vpop.f32.mrb[56].mxu1 }
 0x247   : > { %3632 = vst [vmem:[%s6503_s29 + $0x68] sm:$0xff] %v3610_v14  ;;  %v3560_v55 = vadd.f32 %v3538_v32, %v6377_v24  ;;  %v3474_v1 = vmax.f32 %v6469_v54, %v3286_v44  ;;  %v3539_v35 = vmax.f32 %v3517_v56, %v3425_v53  ;;  %v3288_v39 = vpop.f32.mrb[57].mxu1 }
 0x248   : > { %v3290_v23 = vpop.f32.mrb[58].mxu1 }
 0x249   : > { %v3589_v15 = vadd.f32 %v6493_v63, %v3560_v55  ;;  %v3561_v33 = vadd.f32 %v3539_v35, %v6369_v61  ;;  %v3496_v62 = vmax.f32 %v3474_v1, %v3288_v39  ;;  %v3475_v60 = vmax.f32 %v6464_v9, %v3290_v23  ;;  %v3292_v2 = vpop.f32.mrb[59].mxu1  ;;  %v3429_v13 = vpop.f32.mrb[164].mxu0  ;;  %v7061_v61 = vld [vmem:[#allocation34_spill] sm:$0xff] }
 0x24a   : > { %v3431_v21 = vpop.f32.mrb[165].mxu0 }
 0x24b   : > { %v3611_v16 = vmax.f32 %v3589_v15, 0.0  ;;  %v3590_v24 = vadd.f32 %v6493_v63, %v3561_v33  ;;  %v3497_v58 = vmax.f32 %v3475_v60, %v3292_v2  ;;  %v3518_v54 = vmax.f32 %v3496_v62, %v3429_v13  ;;  %v3433_v26 = vpop.f32.mrb[166].mxu0  ;;  %v7064_v33 = vld [vmem:[#allocation7_spill] sm:$0xff]  ;;  %v7065_v2 = vld [vmem:[#allocation5_spill] sm:$0xff] }
 0x24c   : > { %v3435_v7 = vpop.f32.mrb[167].mxu0 }
 0x24d   : > { %3633 = vst [vmem:[%s6503_s29 + $0x70] sm:$0xff] %v3611_v16  ;;  %v3612_v27 = vmax.f32 %v3590_v24, 0.0  ;;  %v3540_v10 = vmax.f32 %v3518_v54, %v3431_v21  ;;  %v3519_v20 = vmax.f32 %v3497_v58, %v3433_v26 }
 0x24e   : > { %v3296_v36 = vpop.f32.mrb[60].mxu1 }
 0x24f   : > { %3634 = vst [vmem:[%s6503_s29 + $0x78] sm:$0xff] %v3612_v27  ;;  %v3562_v17 = vadd.f32 %v3540_v10, %v7061_v61  ;;  %v3476_v9 = vmax.f32 %v6483_v50, %v3296_v36  ;;  %v3541_v30 = vmax.f32 %v3519_v20, %v3435_v7  ;;  %v3298_v42 = vpop.f32.mrb[61].mxu1 }
 0x250   : > { %v3300_v8 = vpop.f32.mrb[62].mxu1 }
 0x251   : > { %v3591_v37 = vadd.f32 %v6493_v63, %v3562_v17  ;;  %v3563_v3 = vadd.f32 %v3541_v30, %v7062_v45  ;;  %v3498_v48 = vmax.f32 %v3476_v9, %v3298_v42  ;;  %v3477_v38 = vmax.f32 %v6479_v11, %v3300_v8  ;;  %v3302_v57 = vpop.f32.mrb[63].mxu1  ;;  %v3439_v41 = vpop.f32.mrb[168].mxu0 }
 0x252   : > { %v3441_v47 = vpop.f32.mrb[169].mxu0 }
 0x253   : > { %v3613_v19 = vmax.f32 %v3591_v37, 0.0  ;;  %v3592_v51 = vadd.f32 %v6493_v63, %v3563_v3  ;;  %v3499_v25 = vmax.f32 %v3477_v38, %v3302_v57  ;;  %v3520_v50 = vmax.f32 %v3498_v48, %v3439_v41  ;;  %v3443_v40 = vpop.f32.mrb[170].mxu0 }
 0x254   : > { %v3445_v43 = vpop.f32.mrb[171].mxu0 }
 0x255   : > { %3635 = vst [vmem:[%s6503_s29 + $0x80] sm:$0xff] %v3613_v19  ;;  %v3614_v34 = vmax.f32 %v3592_v51, 0.0  ;;  %v3542_v31 = vmax.f32 %v3520_v50, %v3441_v47  ;;  %v3521_v46 = vmax.f32 %v3499_v25, %v3443_v40 }
 0x256   : > { %v3306_v22 = vpop.f32.mrb[64].mxu1 }
 0x257   : > { %3636 = vst [vmem:[%s6503_s29 + $0x88] sm:$0xff] %v3614_v34  ;;  %v3564_v52 = vadd.f32 %v3542_v31, %v6432_v29  ;;  %v3478_v11 = vmax.f32 %v6495_v28, %v3306_v22  ;;  %v3543_v6 = vmax.f32 %v3521_v46, %v3445_v43  ;;  %v3308_v59 = vpop.f32.mrb[65].mxu1 }
 0x258   : > { %v3310_v4 = vpop.f32.mrb[66].mxu1 }
 0x259   : > { %v3593_v5 = vadd.f32 %v6493_v63, %v3564_v52  ;;  %v3565_v12 = vadd.f32 %v3543_v6, %v7063_v18  ;;  %v3500_v0 = vmax.f32 %v3478_v11, %v3308_v59  ;;  %v3479_v53 = vmax.f32 %v6486_v49, %v3310_v4  ;;  %v3312_v14 = vpop.f32.mrb[67].mxu1 }
 0x25b   : > { %v3615_v32 = vmax.f32 %v3593_v5, 0.0  ;;  %v3594_v56 = vadd.f32 %v6493_v63, %v3565_v12  ;;  %v3501_v44 = vmax.f32 %v3479_v53, %v3312_v14 }
 0x25d   : > { %3637 = vst [vmem:[%s6503_s29 + $0x90] sm:$0xff] %v3615_v32  ;;  %v3616_v29 = vmax.f32 %v3594_v56, 0.0 }
 0x25e   : > { %v3449_v55 = vpop.f32.mrb[68].mxu1 }
 0x25f   : > { %3638 = vst [vmem:[%s6503_s29 + $0x98] sm:$0xff] %v3616_v29  ;;  %v3522_v28 = vmax.f32 %v3500_v0, %v3449_v55  ;;  %v3451_v1 = vpop.f32.mrb[69].mxu1 }
 0x260   : > { %v3453_v35 = vpop.f32.mrb[70].mxu1 }
 0x261   : > { %v3544_v39 = vmax.f32 %v3522_v28, %v3451_v1  ;;  %v3523_v23 = vmax.f32 %v3501_v44, %v3453_v35  ;;  %v3455_v15 = vpop.f32.mrb[71].mxu1 }
 0x263   : > { %v3566_v49 = vadd.f32 %v3544_v39, %v7064_v33  ;;  %v3545_v62 = vmax.f32 %v3523_v23, %v3455_v15 }
 0x265   : > { %v3595_v60 = vadd.f32 %v6493_v63, %v3566_v49  ;;  %v3567_v13 = vadd.f32 %v3545_v62, %v7065_v2  ;;  %3648 = sbr.rel (!%p4671_p5) target bundleno = 648 (0x288), region = 48 }
 0x267   : > { %v3617_v21 = vmax.f32 %v3595_v60, 0.0  ;;  %v3596_v16 = vadd.f32 %v6493_v63, %v3567_v13 }
 0x269   : > { %3639 = vst [vmem:[%s6503_s29 + $0xa0] sm:$0xff] %v3617_v21  ;;  %v3618_v24 = vmax.f32 %v3596_v16, 0.0 }
 0x26b   : > { %3640 = vst [vmem:[%s6503_s29 + $0xa8] sm:$0xff] %v3618_v24 }
 0x26c   : > { %s7071_s12 = smov (!%p3651_p11, %s3650_s12), 22 }
 0x26d   : > { %s6592_s13 = sshll.u32 %s7071_s12, 7 }
 0x26e   : > { %s3655_s15 = ssub.s32 2816, %s6592_s13 }
 0x26f   : > { %3656 = vsyncadd %s6587_s10, %s3655_s15  ;;  %p3854_p12 = scmp.ne.s32.totalorder %s6592_s13, 0  ;;  %s3860_s16 = smul.u32 2816, %s4654_s25 }
 0x270   : > { %s3661_s17 = sshll.u32 %s6503_s29, 4  ;;  %s4595_s18 = smov [#allocation2]   ;;  %s6604_s17 = int_to_ptr.vmem [resolvable:$true] %s3661_s17 }
 0x271   : > { %s6602_s20 = scalar_lea.hbm %s6654_s6, %s3860_s16  ;;  %s4524_s11 = scalar_lea.vmem %s6604_s17, %s6592_s13 }
 0x272   : > { %p4525_p13 = scmp.ne.s32.totalorder %s6604_s17, %s4524_s11  ;;  %s4528_s9 = sshll.u32 %s4595_s18, 4  ;;  %s4529_s9 = int_to_ptr.vmem [resolvable:$false] %s4528_s9 }
 0x273   : > { %s4530_s25 = scalar_lea.vmem %s4529_s9, 5632  ;;  %p4531_p2 = scmp.lt.s32.totalorder %s6604_s17, %s4529_s9 }
 0x274   : > { %p4526_p0 = pnand %p4525_p13, %p3854_p12  ;;  %p4532_p3 = scmp.lt.s32.totalorder %s4530_s25, %s4524_s11 }
 0x276   : > { %p4527_p1 = pneg %p4526_p0  ;;  %p4533_p4 = por %p4532_p3, %p4531_p2 }
 0x278   : > { %p4534_p5 = pnand %p4533_p4, %p4527_p1 }
 0x27a   : > { %4537 = shalt.err (!%p4534_p5)
}
 0x27b   : > { %s4538_s26 = scalar_lea.hbm %s6602_s20, %s6592_s13  ;;  %s4542_s29 = scalar_lea.hbm %s6654_s6, 10368 }
 0x27c   : > { %p4539_p7 = scmp.ne.s32.totalorder %s6602_s20, %s4538_s26  ;;  %p4543_p10 = scmp.lt.u32.totalorder %s6602_s20, %s6654_s6 }
 0x27d   : > { %p4544_p11 = scmp.lt.u32.totalorder %s4542_s29, %s4538_s26  ;;  %p4546_p0 = scmp.lt.u32.totalorder %s4538_s26, %s6602_s20 }
 0x27e   : > { %p4540_p8 = pnand %p4539_p7, %p3854_p12 }
 0x27f   : > { %p4545_p13 = por %p4544_p11, %p4543_p10 }
 0x280   : > { %p4541_p9 = pneg %p4540_p8 }
 0x281   : > { %p4547_p1 = por %p4546_p0, %p4545_p13 }
 0x283   : > { %p4548_p2 = pnand %p4547_p1, %p4541_p9 }
 0x285   : > { %4551 = shalt.err (!%p4548_p2)
}
 0x286   : > { %s4596_s16 = smov 128   ;;  %s4597_s7 = smov 8  }
 0x287   : > { %3667 = dma.vmem_to_hbm [thread:$0]  (%p3854_p12), %s6604_s17, %s6592_s13, %s6602_s20, %s6587_s10, %s4596_s16, %s4596_s16, %s4597_s7  }
 0x288 PF: > { %p4447_p3 = scmp.ge.s32.totalorder %s4586_s24, 2  ;;  %s3676_s19 = sand.u32 1, %s4574_s21  }
 0x289   : > { %s3677_s11 = scalar_lea.sflag [#allocation3], %s3676_s19 }
 0x28a   : > { %p4444_p4 = pnand %p4447_p3, %p4675_p6 }
 0x28c   : > { %4569 = dma.done.wait (!%p4444_p4), %s3677_s11, 2816  }
 0x28d   : > { %4571 = vsyncadd (!%p4444_p4), %s3677_s11, 4294964480  ;;  %p16_p5 = scmp.ge.s32.totalorder %s4658_s27, 6   ;;  %s7066_s21 = smov %s4578_s22 }
 0x28e   : > { %s7067_s22 = smov %s4582_s23  ;;  %s7068_s23 = smov %s4669_s30 }
 0x28f   : > { %s7069_s24 = smov %s4658_s27  ;;  %18 = sbr.rel (!%p16_p5) target bundleno = 3 (0x3), region = 82 }
 0x296   :  { %3682 = vsyncpa [#allocation3], 1 }
 0x297   :  { %3684 = vsyncpa [#allocation3 + $0x1], 1 }

</bundles_post_ra>
